<compile_context>
chip_gen: v5e
topology: v5e:2x2
jax: 0.10.0
libtpu: 0.0.40
codegen_flags: <defaults>
</compile_context>

<pallas_src>
import math

import jax
import jax.numpy as jnp
from jax import lax
from jax.experimental import pallas as pl
from jax.experimental.pallas import tpu as pltpu

# ----- small config consistent with a torchvision VisionTransformer -----
BATCH = 2
IMG = 16
PATCH = 8
CHANS = 3
HIDDEN = 32
HEADS = 2
HEAD_DIM = HIDDEN // HEADS
MLP_DIM = 64
LAYERS = 2
CLASSES = 10
LN_EPS = 1e-6
NPH = IMG // PATCH
N_PATCH = NPH * NPH                # 4
SEQ = N_PATCH + 1                  # 5 = class token + patches
NS = BATCH * SEQ                   # 10: batch folded into rows
HNS = HEADS * NS                   # 20: heads stacked on the sublane axis
CPP = CHANS * PATCH * PATCH        # 192
PIX = CHANS * IMG * IMG            # 768
EMB_COLS = N_PATCH * HIDDEN        # 128 (lane-dense patch-embed output)


def _ln(x):
    """LayerNorm WITHOUT affine — gamma/beta are folded into the next matmul."""
    mu = jnp.mean(x, axis=-1, keepdims=True)
    var = jnp.mean((x - mu) ** 2, axis=-1, keepdims=True)
    return (x - mu) * lax.rsqrt(var + LN_EPS)


def _bf(x):
    return x.astype(jnp.bfloat16)


def _gelu_exact(x):
    """erf-GELU (torch nn.GELU default). erf via Abramowitz–Stegun 7.1.26
    (|err| < 1.5e-7), built only from exp/mul/add/select (guaranteed lowerings)."""
    z = x * (1.0 / math.sqrt(2.0))
    a1, a2, a3, a4, a5, p0 = (0.254829592, -0.284496736, 1.421413741,
                              -1.453152027, 1.061405429, 0.3275911)
    az = jnp.abs(z)
    t = 1.0 / (1.0 + p0 * az)
    poly = ((((a5 * t + a4) * t + a3) * t + a2) * t + a1) * t
    erf_abs = 1.0 - poly * jnp.exp(-az * az)
    erf = jnp.where(z >= 0.0, erf_abs, -erf_abs)
    return 0.5 * x * (1.0 + erf)


# ------------------------------------------------------------------ fused kernel
def _vit_kernel(
    x_ref,                               # (BATCH, C*H*W) f32 — raw image, flat
    embw_ref,                            # (C*H*W, N_PATCH*D) bf16 — conv_proj as dense matmul
    convb_ref,                           # (1, D) f32
    cls_ref, pos_ref,                    # (1, D), (SEQ, D) f32
    qkvw_ref, qkvb_ref,                  # (L, D, 3D) bf16, (L, 1, 3D) f32  (ln1 folded in)
    projw_ref, projb_ref,                # (L, D, D)  bf16, (L, 1, D)  f32
    fc1w_ref, fc1b_ref,                  # (L, D, MLP) bf16, (L, 1, MLP) f32 (ln2 folded in)
    fc2w_ref, fc2b_ref,                  # (L, MLP, D) bf16, (L, 1, D) f32
    headw_ref, headb_ref,                # (D, CLASSES) bf16, (1, CLASSES) f32 (final ln folded)
    o_ref,                               # (BATCH, CLASSES) f32
    tok_ref,                             # VMEM scratch (NS, D) f32 — tokens resident all layers
    st_ref,                              # VMEM scratch (HNS, 3*HEAD_DIM) f32 — stacked q/k/v
    ho_ref,                              # VMEM scratch (NS, D) f32 — re-packed head outputs
):
    # ---- patch embedding: one lane-dense bf16 MXU matmul, no activation transpose ----
    emb_flat = jnp.dot(_bf(x_ref[...]), embw_ref[...],
                       preferred_element_type=jnp.float32)        # (BATCH, N_PATCH*D)

    # ---- assemble [cls, patch tokens] per image + positional embedding (f32) ----
    for b in range(BATCH):                                        # static unroll (BATCH=2)
        tok_ref[b * SEQ:b * SEQ + 1, :] = cls_ref[...] + pos_ref[0:1, :]
        for p in range(N_PATCH):
            tok_ref[b * SEQ + 1 + p:b * SEQ + 2 + p, :] = (
                emb_flat[b:b + 1, p * HIDDEN:(p + 1) * HIDDEN]
                + convb_ref[...] + pos_ref[1 + p:2 + p, :]
            )

    # ---- block-diagonal (head, batch) mask for head-stacked / batch-folded rows ----
    # row index r = h*NS + b*SEQ + s  ->  group = (h, b); built w/o integer vector div.
    row = lax.broadcasted_iota(jnp.int32, (HNS, HNS), 0)
    col = lax.broadcasted_iota(jnp.int32, (HNS, HNS), 1)
    allowed = jnp.zeros((HNS, HNS), jnp.bool_)
    for g in range(HNS // SEQ):                                   # 4 static groups
        lo, hi = g * SEQ, (g + 1) * SEQ
        allowed = allowed | ((row >= lo) & (row < hi) & (col >= lo) & (col < hi))
    neg = jnp.where(allowed, 0.0, -1e30).astype(jnp.float32)

    scale = 1.0 / math.sqrt(HEAD_DIM)

    def layer_body(l, carry):
        x = tok_ref[...]                                          # (NS, D) f32

        # ----- LN1 (affine folded into weights) + fused QKV projection -----
        qkv = (jnp.dot(_bf(_ln(x)), qkvw_ref[l],
                       preferred_element_type=jnp.float32) + qkvb_ref[l])  # (NS, 3D) f32

        # ----- stack heads along sublanes: one QK^T, one softmax, one PV -----
        for h in range(HEADS):                                    # cheap slice stores
            st_ref[h * NS:(h + 1) * NS, 0:HEAD_DIM] = \
                qkv[:, h * HEAD_DIM:(h + 1) * HEAD_DIM]
            st_ref[h * NS:(h + 1) * NS, HEAD_DIM:2 * HEAD_DIM] = \
                qkv[:, HIDDEN + h * HEAD_DIM:HIDDEN + (h + 1) * HEAD_DIM]
            st_ref[h * NS:(h + 1) * NS, 2 * HEAD_DIM:3 * HEAD_DIM] = \
                qkv[:, 2 * HIDDEN + h * HEAD_DIM:2 * HIDDEN + (h + 1) * HEAD_DIM]
        q_st = st_ref[:, 0:HEAD_DIM]                              # (HNS, hd)
        k_st = st_ref[:, HEAD_DIM:2 * HEAD_DIM]
        v_st = st_ref[:, 2 * HEAD_DIM:3 * HEAD_DIM]

        s = lax.dot_general(_bf(q_st), _bf(k_st), (((1,), (1,)), ((), ())),
                            preferred_element_type=jnp.float32)   # (HNS, HNS)
        s = s * scale + neg
        s_max = jnp.max(s, axis=-1, keepdims=True)
        e = jnp.exp(s - s_max)
        p = e * pl.reciprocal(jnp.sum(e, axis=-1, keepdims=True), approx=True)
        ho_st = jnp.dot(_bf(p), _bf(v_st),
                        preferred_element_type=jnp.float32)       # (HNS, hd)

        # ----- re-pack heads on the lane axis -> single out-projection matmul -----
        for h in range(HEADS):
            ho_ref[:, h * HEAD_DIM:(h + 1) * HEAD_DIM] = ho_st[h * NS:(h + 1) * NS, :]
        attn = (jnp.dot(_bf(ho_ref[...]), projw_ref[l],
                        preferred_element_type=jnp.float32) + projb_ref[l])
        x = x + attn                                              # residual (dropout = id)

        # ----- LN2 (affine folded) + MLP (erf-GELU, f32 elementwise) -----
        h1 = (jnp.dot(_bf(_ln(x)), fc1w_ref[l],
                      preferred_element_type=jnp.float32) + fc1b_ref[l])
        h1 = _gelu_exact(h1)
        h2 = (jnp.dot(_bf(h1), fc2w_ref[l],
                      preferred_element_type=jnp.float32) + fc2b_ref[l])
        tok_ref[...] = x + h2                                     # residual, stays in VMEM
        return carry

    lax.fori_loop(0, LAYERS, layer_body, 0, unroll=True)

    # ---- final LN (affine folded into head weights) + classification head ----
    logits_all = (jnp.dot(_bf(_ln(tok_ref[...])), headw_ref[...],
                          preferred_element_type=jnp.float32) + headb_ref[...])  # (NS, C)
    for b in range(BATCH):
        o_ref[b:b + 1, :] = logits_all[b * SEQ:b * SEQ + 1, :]


# ------------------------------------------------------------------ params
def init_params(key):
    keys = jax.random.split(key, 6 + LAYERS)

    def nrm(k, shape):
        return 0.02 * jax.random.normal(k, shape, jnp.float32)

    params = {
        # conv_proj weight (D, C, p, p) stored pre-flattened/transposed: (C*p*p, D)
        "conv_w": nrm(keys[0], (CPP, HIDDEN)),
        "conv_b": nrm(keys[1], (1, HIDDEN)),
        "cls": nrm(keys[2], (1, HIDDEN)),
        "pos": nrm(keys[3], (SEQ, HIDDEN)),
        "ln_w": jnp.ones((1, HIDDEN), jnp.float32),
        "ln_b": jnp.zeros((1, HIDDEN), jnp.float32),
        "head_w": nrm(keys[4], (HIDDEN, CLASSES)),     # torch Linear weight, transposed
        "head_b": nrm(keys[5], (1, CLASSES)),
    }
    acc = {name: [] for name in
           ("ln1w", "ln1b", "qkvw", "qkvb", "projw", "projb",
            "ln2w", "ln2b", "fc1w", "fc1b", "fc2w", "fc2b")}
    for i in range(LAYERS):
        lk = jax.random.split(keys[6 + i], 8)
        acc["ln1w"].append(jnp.ones((1, HIDDEN), jnp.float32))
        acc["ln1b"].append(jnp.zeros((1, HIDDEN), jnp.float32))
        acc["qkvw"].append(nrm(lk[0], (HIDDEN, 3 * HIDDEN)))   # in_proj_weight.T
        acc["qkvb"].append(nrm(lk[1], (1, 3 * HIDDEN)))
        acc["projw"].append(nrm(lk[2], (HIDDEN, HIDDEN)))      # out_proj.weight.T
        acc["projb"].append(nrm(lk[3], (1, HIDDEN)))
        acc["ln2w"].append(jnp.ones((1, HIDDEN), jnp.float32))
        acc["ln2b"].append(jnp.zeros((1, HIDDEN), jnp.float32))
        acc["fc1w"].append(nrm(lk[4], (HIDDEN, MLP_DIM)))
        acc["fc1b"].append(nrm(lk[5], (1, MLP_DIM)))
        acc["fc2w"].append(nrm(lk[6], (MLP_DIM, HIDDEN)))
        acc["fc2b"].append(nrm(lk[7], (1, HIDDEN)))
    params["layers"] = {k: jnp.stack(v, axis=0) for k, v in acc.items()}
    return params


def _fold_ln(ln_w, ln_b, w, b):
    """Exact fold of a LayerNorm affine into the following Linear:
       (x̂*γ + β) @ W + b  ==  x̂ @ (γ[:,None]*W) + (β @ W + b)."""
    w_f = jnp.swapaxes(ln_w, -1, -2) * w
    b_f = jnp.matmul(ln_b, w) + b
    return w_f, b_f


def _expand_conv(conv_w):
    """Expand the stride=PATCH conv_proj into one dense (C*H*W, N_PATCH*D) matmul
    weight so the kernel consumes the raw image with NO wrapper-side transpose."""
    w4 = conv_w.reshape(CHANS, PATCH, PATCH, HIDDEN)
    full = jnp.zeros((CHANS, IMG, IMG, N_PATCH, HIDDEN), jnp.float32)
    for iy in range(NPH):
        for ix in range(NPH):
            p = iy * NPH + ix
            full = full.at[:, iy * PATCH:(iy + 1) * PATCH,
                           ix * PATCH:(ix + 1) * PATCH, p, :].set(w4)
    return full.reshape(PIX, EMB_COLS)


def prepare_params(params):
    """One-time host-side preprocessing: LN-affine folds, conv->dense expansion,
    bf16 cast of every MXU weight operand (biases stay f32)."""
    lyr = params["layers"]
    bf = jnp.bfloat16
    qkvw, qkvb = _fold_ln(lyr["ln1w"], lyr["ln1b"], lyr["qkvw"], lyr["qkvb"])
    fc1w, fc1b = _fold_ln(lyr["ln2w"], lyr["ln2b"], lyr["fc1w"], lyr["fc1b"])
    headw, headb = _fold_ln(params["ln_w"], params["ln_b"],
                            params["head_w"], params["head_b"])
    return {
        "embed_w": _expand_conv(params["conv_w"]).astype(bf),
        "conv_b": params["conv_b"],
        "cls": params["cls"],
        "pos": params["pos"],
        "qkvw": qkvw.astype(bf), "qkvb": qkvb,
        "projw": lyr["projw"].astype(bf), "projb": lyr["projb"],
        "fc1w": fc1w.astype(bf), "fc1b": fc1b,
        "fc2w": lyr["fc2w"].astype(bf), "fc2b": lyr["fc2b"],
        "head_w": headw.astype(bf), "head_b": headb,
    }


# ------------------------------------------------------------------ forward
@jax.jit
def vit_forward(x, prep):
    """x: (BATCH, C, H, W) f32 -> logits (BATCH, CLASSES). One fused Pallas kernel;
    the only wrapper op is a free contiguous reshape (no transpose launch)."""
    x_flat = x.reshape(BATCH, PIX)
    args = (x_flat,
            prep["embed_w"], prep["conv_b"], prep["cls"], prep["pos"],
            prep["qkvw"], prep["qkvb"], prep["projw"], prep["projb"],
            prep["fc1w"], prep["fc1b"], prep["fc2w"], prep["fc2b"],
            prep["head_w"], prep["head_b"])
    vmem = pl.BlockSpec(memory_space=pltpu.MemorySpace.VMEM)
    return pl.pallas_call(
        _vit_kernel,
        out_shape=jax.ShapeDtypeStruct((BATCH, CLASSES), jnp.float32),
        in_specs=[vmem] * len(args),
        out_specs=vmem,
        scratch_shapes=[pltpu.VMEM((NS, HIDDEN), jnp.float32),
                        pltpu.VMEM((HNS, 3 * HEAD_DIM), jnp.float32),
                        pltpu.VMEM((NS, HIDDEN), jnp.float32)],
        # rough advisory numbers for the XLA scheduler
        cost_estimate=pl.CostEstimate(flops=780_000, transcendentals=2_500,
                                      bytes_accessed=240_000),
    )(*args)


if __name__ == "__main__":
    key = jax.random.PRNGKey(0)
    pkey, xkey = jax.random.split(key)
    params = init_params(pkey)
    prep = prepare_params(params)          # host-side one-time fold/cast/expand
    x = jax.random.normal(xkey, (BATCH, CHANS, IMG, IMG), jnp.float32)

    logits = vit_forward(x, prep)
    jax.block_until_ready(logits)
    assert logits.shape == (BATCH, CLASSES)
    assert bool(jnp.all(jnp.isfinite(logits)))
    print("KERNEL_OK")
</pallas_src>

<mosaic_0001>
module attributes {stable_mosaic.version = 11 : i64} {
  func.func @_vit_kernel(%arg0: memref<2x768xf32, #tpu.memory_space<vmem>>, %arg1: memref<768x128xbf16, #tpu.memory_space<vmem>>, %arg2: memref<1x32xf32, #tpu.memory_space<vmem>>, %arg3: memref<1x32xf32, #tpu.memory_space<vmem>>, %arg4: memref<5x32xf32, #tpu.memory_space<vmem>>, %arg5: memref<2x32x96xbf16, #tpu.memory_space<vmem>>, %arg6: memref<2x1x96xf32, #tpu.memory_space<vmem>>, %arg7: memref<2x32x32xbf16, #tpu.memory_space<vmem>>, %arg8: memref<2x1x32xf32, #tpu.memory_space<vmem>>, %arg9: memref<2x32x64xbf16, #tpu.memory_space<vmem>>, %arg10: memref<2x1x64xf32, #tpu.memory_space<vmem>>, %arg11: memref<2x64x32xbf16, #tpu.memory_space<vmem>>, %arg12: memref<2x1x32xf32, #tpu.memory_space<vmem>>, %arg13: memref<32x10xbf16, #tpu.memory_space<vmem>>, %arg14: memref<1x10xf32, #tpu.memory_space<vmem>>, %arg15: memref<2x10xf32, #tpu.memory_space<vmem>>, %arg16: memref<10x32xf32, #tpu.memory_space<vmem>>, %arg17: memref<20x48xf32, #tpu.memory_space<vmem>>, %arg18: memref<10x32xf32, #tpu.memory_space<vmem>>) attributes {dimension_semantics = [], scalar_prefetch = 0 : i64, scratch_operands = 3 : i64, tpu.core_type = #tpu.core_type<tc>} {
    %c0 = arith.constant 0 : index
    %c0_0 = arith.constant 0 : index
    %0 = vector.load %arg0[%c0, %c0_0] : memref<2x768xf32, #tpu.memory_space<vmem>>, vector<2x768xf32>
    %1 = arith.truncf %0 : vector<2x768xf32> to vector<2x768xbf16>
    %c0_1 = arith.constant 0 : index
    %c0_2 = arith.constant 0 : index
    %2 = vector.load %arg1[%c0_1, %c0_2] : memref<768x128xbf16, #tpu.memory_space<vmem>>, vector<768x128xbf16>
    %cst = arith.constant dense<0.000000e+00> : vector<2x128xf32>
    %3 = tpu.matmul %1, %2, %cst {dimension_numbers = #tpu.dot_dimension_numbers<[1], [0], [0], [1], [0, 0, 1, 1], [], []>} : vector<2x768xbf16>, vector<768x128xbf16>, vector<2x128xf32> -> vector<2x128xf32>
    %c0_3 = arith.constant 0 : index
    %c0_4 = arith.constant 0 : index
    %4 = vector.load %arg3[%c0_3, %c0_4] : memref<1x32xf32, #tpu.memory_space<vmem>>, vector<1x32xf32>
    %c0_5 = arith.constant 0 : index
    %c0_6 = arith.constant 0 : index
    %5 = vector.load %arg4[%c0_5, %c0_6] : memref<5x32xf32, #tpu.memory_space<vmem>>, vector<1x32xf32>
    %6 = arith.addf %4, %5 : vector<1x32xf32>
    %c0_7 = arith.constant 0 : index
    %c0_8 = arith.constant 0 : index
    %7 = vector.load %arg16[%c0_7, %c0_8] : memref<10x32xf32, #tpu.memory_space<vmem>>, vector<1x32xf32>
    tpu.vector_store %arg16[%c0_7, %c0_8], %6 {strides = array<i32>} : memref<10x32xf32, #tpu.memory_space<vmem>>, vector<1x32xf32>,
    %8 = vector.extract_strided_slice %3 {offsets = [0, 0], sizes = [1, 32], strides = [1, 1]} : vector<2x128xf32> to vector<1x32xf32>
    %c0_9 = arith.constant 0 : index
    %c0_10 = arith.constant 0 : index
    %9 = vector.load %arg2[%c0_9, %c0_10] : memref<1x32xf32, #tpu.memory_space<vmem>>, vector<1x32xf32>
    %10 = arith.addf %8, %9 : vector<1x32xf32>
    %c1 = arith.constant 1 : index
    %c0_11 = arith.constant 0 : index
    %11 = vector.load %arg4[%c1, %c0_11] : memref<5x32xf32, #tpu.memory_space<vmem>>, vector<1x32xf32>
    %12 = arith.addf %10, %11 : vector<1x32xf32>
    %c1_12 = arith.constant 1 : index
    %c0_13 = arith.constant 0 : index
    %13 = vector.load %arg16[%c1_12, %c0_13] : memref<10x32xf32, #tpu.memory_space<vmem>>, vector<1x32xf32>
    tpu.vector_store %arg16[%c1_12, %c0_13], %12 {strides = array<i32>} : memref<10x32xf32, #tpu.memory_space<vmem>>, vector<1x32xf32>,
    %14 = vector.extract_strided_slice %3 {offsets = [0, 32], sizes = [1, 32], strides = [1, 1]} : vector<2x128xf32> to vector<1x32xf32>
    %c0_14 = arith.constant 0 : index
    %c0_15 = arith.constant 0 : index
    %15 = vector.load %arg2[%c0_14, %c0_15] : memref<1x32xf32, #tpu.memory_space<vmem>>, vector<1x32xf32>
    %16 = arith.addf %14, %15 : vector<1x32xf32>
    %c2 = arith.constant 2 : index
    %c0_16 = arith.constant 0 : index
    %17 = vector.load %arg4[%c2, %c0_16] : memref<5x32xf32, #tpu.memory_space<vmem>>, vector<1x32xf32>
    %18 = arith.addf %16, %17 : vector<1x32xf32>
    %c2_17 = arith.constant 2 : index
    %c0_18 = arith.constant 0 : index
    %19 = vector.load %arg16[%c2_17, %c0_18] : memref<10x32xf32, #tpu.memory_space<vmem>>, vector<1x32xf32>
    tpu.vector_store %arg16[%c2_17, %c0_18], %18 {strides = array<i32>} : memref<10x32xf32, #tpu.memory_space<vmem>>, vector<1x32xf32>,
    %20 = vector.extract_strided_slice %3 {offsets = [0, 64], sizes = [1, 32], strides = [1, 1]} : vector<2x128xf32> to vector<1x32xf32>
    %c0_19 = arith.constant 0 : index
    %c0_20 = arith.constant 0 : index
    %21 = vector.load %arg2[%c0_19, %c0_20] : memref<1x32xf32, #tpu.memory_space<vmem>>, vector<1x32xf32>
    %22 = arith.addf %20, %21 : vector<1x32xf32>
    %c3 = arith.constant 3 : index
    %c0_21 = arith.constant 0 : index
    %23 = vector.load %arg4[%c3, %c0_21] : memref<5x32xf32, #tpu.memory_space<vmem>>, vector<1x32xf32>
    %24 = arith.addf %22, %23 : vector<1x32xf32>
    %c3_22 = arith.constant 3 : index
    %c0_23 = arith.constant 0 : index
    %25 = vector.load %arg16[%c3_22, %c0_23] : memref<10x32xf32, #tpu.memory_space<vmem>>, vector<1x32xf32>
    tpu.vector_store %arg16[%c3_22, %c0_23], %24 {strides = array<i32>} : memref<10x32xf32, #tpu.memory_space<vmem>>, vector<1x32xf32>,
    %26 = vector.extract_strided_slice %3 {offsets = [0, 96], sizes = [1, 32], strides = [1, 1]} : vector<2x128xf32> to vector<1x32xf32>
    %c0_24 = arith.constant 0 : index
    %c0_25 = arith.constant 0 : index
    %27 = vector.load %arg2[%c0_24, %c0_25] : memref<1x32xf32, #tpu.memory_space<vmem>>, vector<1x32xf32>
    %28 = arith.addf %26, %27 : vector<1x32xf32>
    %c4 = arith.constant 4 : index
    %c0_26 = arith.constant 0 : index
    %29 = vector.load %arg4[%c4, %c0_26] : memref<5x32xf32, #tpu.memory_space<vmem>>, vector<1x32xf32>
    %30 = arith.addf %28, %29 : vector<1x32xf32>
    %c4_27 = arith.constant 4 : index
    %c0_28 = arith.constant 0 : index
    %31 = vector.load %arg16[%c4_27, %c0_28] : memref<10x32xf32, #tpu.memory_space<vmem>>, vector<1x32xf32>
    tpu.vector_store %arg16[%c4_27, %c0_28], %30 {strides = array<i32>} : memref<10x32xf32, #tpu.memory_space<vmem>>, vector<1x32xf32>,
    %c0_29 = arith.constant 0 : index
    %c0_30 = arith.constant 0 : index
    %32 = vector.load %arg3[%c0_29, %c0_30] : memref<1x32xf32, #tpu.memory_space<vmem>>, vector<1x32xf32>
    %c0_31 = arith.constant 0 : index
    %c0_32 = arith.constant 0 : index
    %33 = vector.load %arg4[%c0_31, %c0_32] : memref<5x32xf32, #tpu.memory_space<vmem>>, vector<1x32xf32>
    %34 = arith.addf %32, %33 : vector<1x32xf32>
    %c5 = arith.constant 5 : index
    %c0_33 = arith.constant 0 : index
    %35 = vector.load %arg16[%c5, %c0_33] : memref<10x32xf32, #tpu.memory_space<vmem>>, vector<1x32xf32>
    tpu.vector_store %arg16[%c5, %c0_33], %34 {strides = array<i32>} : memref<10x32xf32, #tpu.memory_space<vmem>>, vector<1x32xf32>,
    %36 = vector.extract_strided_slice %3 {offsets = [1, 0], sizes = [1, 32], strides = [1, 1]} : vector<2x128xf32> to vector<1x32xf32>
    %c0_34 = arith.constant 0 : index
    %c0_35 = arith.constant 0 : index
    %37 = vector.load %arg2[%c0_34, %c0_35] : memref<1x32xf32, #tpu.memory_space<vmem>>, vector<1x32xf32>
    %38 = arith.addf %36, %37 : vector<1x32xf32>
    %c1_36 = arith.constant 1 : index
    %c0_37 = arith.constant 0 : index
    %39 = vector.load %arg4[%c1_36, %c0_37] : memref<5x32xf32, #tpu.memory_space<vmem>>, vector<1x32xf32>
    %40 = arith.addf %38, %39 : vector<1x32xf32>
    %c6 = arith.constant 6 : index
    %c0_38 = arith.constant 0 : index
    %41 = vector.load %arg16[%c6, %c0_38] : memref<10x32xf32, #tpu.memory_space<vmem>>, vector<1x32xf32>
    tpu.vector_store %arg16[%c6, %c0_38], %40 {strides = array<i32>} : memref<10x32xf32, #tpu.memory_space<vmem>>, vector<1x32xf32>,
    %42 = vector.extract_strided_slice %3 {offsets = [1, 32], sizes = [1, 32], strides = [1, 1]} : vector<2x128xf32> to vector<1x32xf32>
    %c0_39 = arith.constant 0 : index
    %c0_40 = arith.constant 0 : index
    %43 = vector.load %arg2[%c0_39, %c0_40] : memref<1x32xf32, #tpu.memory_space<vmem>>, vector<1x32xf32>
    %44 = arith.addf %42, %43 : vector<1x32xf32>
    %c2_41 = arith.constant 2 : index
    %c0_42 = arith.constant 0 : index
    %45 = vector.load %arg4[%c2_41, %c0_42] : memref<5x32xf32, #tpu.memory_space<vmem>>, vector<1x32xf32>
    %46 = arith.addf %44, %45 : vector<1x32xf32>
    %c7 = arith.constant 7 : index
    %c0_43 = arith.constant 0 : index
    %47 = vector.load %arg16[%c7, %c0_43] : memref<10x32xf32, #tpu.memory_space<vmem>>, vector<1x32xf32>
    tpu.vector_store %arg16[%c7, %c0_43], %46 {strides = array<i32>} : memref<10x32xf32, #tpu.memory_space<vmem>>, vector<1x32xf32>,
    %48 = vector.extract_strided_slice %3 {offsets = [1, 64], sizes = [1, 32], strides = [1, 1]} : vector<2x128xf32> to vector<1x32xf32>
    %c0_44 = arith.constant 0 : index
    %c0_45 = arith.constant 0 : index
    %49 = vector.load %arg2[%c0_44, %c0_45] : memref<1x32xf32, #tpu.memory_space<vmem>>, vector<1x32xf32>
    %50 = arith.addf %48, %49 : vector<1x32xf32>
    %c3_46 = arith.constant 3 : index
    %c0_47 = arith.constant 0 : index
    %51 = vector.load %arg4[%c3_46, %c0_47] : memref<5x32xf32, #tpu.memory_space<vmem>>, vector<1x32xf32>
    %52 = arith.addf %50, %51 : vector<1x32xf32>
    %c8 = arith.constant 8 : index
    %c0_48 = arith.constant 0 : index
    %53 = vector.load %arg16[%c8, %c0_48] : memref<10x32xf32, #tpu.memory_space<vmem>>, vector<1x32xf32>
    tpu.vector_store %arg16[%c8, %c0_48], %52 {strides = array<i32>} : memref<10x32xf32, #tpu.memory_space<vmem>>, vector<1x32xf32>,
    %54 = vector.extract_strided_slice %3 {offsets = [1, 96], sizes = [1, 32], strides = [1, 1]} : vector<2x128xf32> to vector<1x32xf32>
    %c0_49 = arith.constant 0 : index
    %c0_50 = arith.constant 0 : index
    %55 = vector.load %arg2[%c0_49, %c0_50] : memref<1x32xf32, #tpu.memory_space<vmem>>, vector<1x32xf32>
    %56 = arith.addf %54, %55 : vector<1x32xf32>
    %c4_51 = arith.constant 4 : index
    %c0_52 = arith.constant 0 : index
    %57 = vector.load %arg4[%c4_51, %c0_52] : memref<5x32xf32, #tpu.memory_space<vmem>>, vector<1x32xf32>
    %58 = arith.addf %56, %57 : vector<1x32xf32>
    %c9 = arith.constant 9 : index
    %c0_53 = arith.constant 0 : index
    %59 = vector.load %arg16[%c9, %c0_53] : memref<10x32xf32, #tpu.memory_space<vmem>>, vector<1x32xf32>
    tpu.vector_store %arg16[%c9, %c0_53], %58 {strides = array<i32>} : memref<10x32xf32, #tpu.memory_space<vmem>>, vector<1x32xf32>,
    %60 = tpu.iota {dimensions = array<i32: 0>} : vector<20x20xi32>
    %61 = tpu.iota {dimensions = array<i32: 1>} : vector<20x20xi32>
    %false = arith.constant false
    %62 = vector.broadcast %false : i1 to vector<20x20xi1>
    %c0_i32 = arith.constant 0 : i32
    %63 = vector.broadcast %c0_i32 : i32 to vector<20x20xi32>
    %64 = arith.cmpi sge, %60, %63 : vector<20x20xi32>
    %c5_i32 = arith.constant 5 : i32
    %65 = vector.broadcast %c5_i32 : i32 to vector<20x20xi32>
    %66 = arith.cmpi slt, %60, %65 : vector<20x20xi32>
    %67 = arith.andi %64, %66 : vector<20x20xi1>
    %c0_i32_54 = arith.constant 0 : i32
    %68 = vector.broadcast %c0_i32_54 : i32 to vector<20x20xi32>
    %69 = arith.cmpi sge, %61, %68 : vector<20x20xi32>
    %70 = arith.andi %67, %69 : vector<20x20xi1>
    %c5_i32_55 = arith.constant 5 : i32
    %71 = vector.broadcast %c5_i32_55 : i32 to vector<20x20xi32>
    %72 = arith.cmpi slt, %61, %71 : vector<20x20xi32>
    %73 = arith.andi %70, %72 : vector<20x20xi1>
    %74 = arith.ori %62, %73 : vector<20x20xi1>
    %c5_i32_56 = arith.constant 5 : i32
    %75 = vector.broadcast %c5_i32_56 : i32 to vector<20x20xi32>
    %76 = arith.cmpi sge, %60, %75 : vector<20x20xi32>
    %c10_i32 = arith.constant 10 : i32
    %77 = vector.broadcast %c10_i32 : i32 to vector<20x20xi32>
    %78 = arith.cmpi slt, %60, %77 : vector<20x20xi32>
    %79 = arith.andi %76, %78 : vector<20x20xi1>
    %c5_i32_57 = arith.constant 5 : i32
    %80 = vector.broadcast %c5_i32_57 : i32 to vector<20x20xi32>
    %81 = arith.cmpi sge, %61, %80 : vector<20x20xi32>
    %82 = arith.andi %79, %81 : vector<20x20xi1>
    %c10_i32_58 = arith.constant 10 : i32
    %83 = vector.broadcast %c10_i32_58 : i32 to vector<20x20xi32>
    %84 = arith.cmpi slt, %61, %83 : vector<20x20xi32>
    %85 = arith.andi %82, %84 : vector<20x20xi1>
    %86 = arith.ori %74, %85 : vector<20x20xi1>
    %c10_i32_59 = arith.constant 10 : i32
    %87 = vector.broadcast %c10_i32_59 : i32 to vector<20x20xi32>
    %88 = arith.cmpi sge, %60, %87 : vector<20x20xi32>
    %c15_i32 = arith.constant 15 : i32
    %89 = vector.broadcast %c15_i32 : i32 to vector<20x20xi32>
    %90 = arith.cmpi slt, %60, %89 : vector<20x20xi32>
    %91 = arith.andi %88, %90 : vector<20x20xi1>
    %c10_i32_60 = arith.constant 10 : i32
    %92 = vector.broadcast %c10_i32_60 : i32 to vector<20x20xi32>
    %93 = arith.cmpi sge, %61, %92 : vector<20x20xi32>
    %94 = arith.andi %91, %93 : vector<20x20xi1>
    %c15_i32_61 = arith.constant 15 : i32
    %95 = vector.broadcast %c15_i32_61 : i32 to vector<20x20xi32>
    %96 = arith.cmpi slt, %61, %95 : vector<20x20xi32>
    %97 = arith.andi %94, %96 : vector<20x20xi1>
    %98 = arith.ori %86, %97 : vector<20x20xi1>
    %c15_i32_62 = arith.constant 15 : i32
    %99 = vector.broadcast %c15_i32_62 : i32 to vector<20x20xi32>
    %100 = arith.cmpi sge, %60, %99 : vector<20x20xi32>
    %c20_i32 = arith.constant 20 : i32
    %101 = vector.broadcast %c20_i32 : i32 to vector<20x20xi32>
    %102 = arith.cmpi slt, %60, %101 : vector<20x20xi32>
    %103 = arith.andi %100, %102 : vector<20x20xi1>
    %c15_i32_63 = arith.constant 15 : i32
    %104 = vector.broadcast %c15_i32_63 : i32 to vector<20x20xi32>
    %105 = arith.cmpi sge, %61, %104 : vector<20x20xi32>
    %106 = arith.andi %103, %105 : vector<20x20xi1>
    %c20_i32_64 = arith.constant 20 : i32
    %107 = vector.broadcast %c20_i32_64 : i32 to vector<20x20xi32>
    %108 = arith.cmpi slt, %61, %107 : vector<20x20xi32>
    %109 = arith.andi %106, %108 : vector<20x20xi1>
    %110 = arith.ori %98, %109 : vector<20x20xi1>
    %cst_65 = arith.constant 0.000000e+00 : f32
    %cst_66 = arith.constant -1.000000e+30 : f32
    %111 = vector.broadcast %cst_65 : f32 to vector<20x20xf32>
    %112 = vector.broadcast %cst_66 : f32 to vector<20x20xf32>
    %113 = arith.select %110, %111, %112 : vector<20x20xi1>, vector<20x20xf32>
    %c0_i32_67 = arith.constant 0 : i32
    %c0_68 = arith.constant 0 : index
    %c0_69 = arith.constant 0 : index
    %114 = vector.load %arg16[%c0_68, %c0_69] : memref<10x32xf32, #tpu.memory_space<vmem>>, vector<10x32xf32>
    %cst_70 = arith.constant dense<0.000000e+00> : vector<10xf32>
    %115 = vector.multi_reduction <add>, %114, %cst_70 [1] : vector<10x32xf32> to vector<10xf32>
    %116 = vector.shape_cast %115 : vector<10xf32> to vector<10x1xf32>
    %cst_71 = arith.constant 3.200000e+01 : f32
    %117 = vector.broadcast %cst_71 : f32 to vector<10x1xf32>
    %118 = arith.divf %116, %117 : vector<10x1xf32>
    %119 = vector.broadcast %118 : vector<10x1xf32> to vector<10x32xf32>
    %120 = arith.subf %114, %119 : vector<10x32xf32>
    %121 = arith.mulf %120, %120 : vector<10x32xf32>
    %cst_72 = arith.constant dense<0.000000e+00> : vector<10xf32>
    %122 = vector.multi_reduction <add>, %121, %cst_72 [1] : vector<10x32xf32> to vector<10xf32>
    %123 = vector.shape_cast %122 : vector<10xf32> to vector<10x1xf32>
    %cst_73 = arith.constant 3.200000e+01 : f32
    %124 = vector.broadcast %cst_73 : f32 to vector<10x1xf32>
    %125 = arith.divf %123, %124 : vector<10x1xf32>
    %126 = vector.broadcast %118 : vector<10x1xf32> to vector<10x32xf32>
    %127 = arith.subf %114, %126 : vector<10x32xf32>
    %cst_74 = arith.constant 9.99999997E-7 : f32
    %128 = vector.broadcast %cst_74 : f32 to vector<10x1xf32>
    %129 = arith.addf %125, %128 : vector<10x1xf32>
    %130 = math.rsqrt %129 : vector<10x1xf32>
    %131 = vector.broadcast %130 : vector<10x1xf32> to vector<10x32xf32>
    %132 = arith.mulf %127, %131 : vector<10x32xf32>
    %133 = arith.truncf %132 : vector<10x32xf32> to vector<10x32xbf16>
    %134 = arith.index_cast %c0_i32_67 : i32 to index
    %c0_75 = arith.constant 0 : index
    %c0_76 = arith.constant 0 : index
    %135 = vector.load %arg5[%134, %c0_75, %c0_76] : memref<2x32x96xbf16, #tpu.memory_space<vmem>>, vector<1x32x96xbf16>
    %136 = vector.shape_cast %135 : vector<1x32x96xbf16> to vector<32x96xbf16>
    %cst_77 = arith.constant dense<0.000000e+00> : vector<10x96xf32>
    %137 = tpu.matmul %133, %136, %cst_77 {dimension_numbers = #tpu.dot_dimension_numbers<[1], [0], [0], [1], [0, 0, 1, 1], [], []>} : vector<10x32xbf16>, vector<32x96xbf16>, vector<10x96xf32> -> vector<10x96xf32>
    %138 = arith.index_cast %c0_i32_67 : i32 to index
    %c0_78 = arith.constant 0 : index
    %c0_79 = arith.constant 0 : index
    %139 = vector.load %arg6[%138, %c0_78, %c0_79] : memref<2x1x96xf32, #tpu.memory_space<vmem>>, vector<1x1x96xf32>
    %140 = vector.shape_cast %139 : vector<1x1x96xf32> to vector<1x96xf32>
    %141 = vector.broadcast %140 : vector<1x96xf32> to vector<10x96xf32>
    %142 = arith.addf %137, %141 : vector<10x96xf32>
    %143 = vector.extract_strided_slice %142 {offsets = [0, 0], sizes = [10, 16], strides = [1, 1]} : vector<10x96xf32> to vector<10x16xf32>
    %c0_80 = arith.constant 0 : index
    %c0_81 = arith.constant 0 : index
    %144 = vector.load %arg17[%c0_80, %c0_81] : memref<20x48xf32, #tpu.memory_space<vmem>>, vector<10x16xf32>
    tpu.vector_store %arg17[%c0_80, %c0_81], %143 {strides = array<i32>} : memref<20x48xf32, #tpu.memory_space<vmem>>, vector<10x16xf32>,
    %145 = vector.extract_strided_slice %142 {offsets = [0, 32], sizes = [10, 16], strides = [1, 1]} : vector<10x96xf32> to vector<10x16xf32>
    %c0_82 = arith.constant 0 : index
    %c16 = arith.constant 16 : index
    %146 = vector.load %arg17[%c0_82, %c16] : memref<20x48xf32, #tpu.memory_space<vmem>>, vector<10x16xf32>
    tpu.vector_store %arg17[%c0_82, %c16], %145 {strides = array<i32>} : memref<20x48xf32, #tpu.memory_space<vmem>>, vector<10x16xf32>,
    %147 = vector.extract_strided_slice %142 {offsets = [0, 64], sizes = [10, 16], strides = [1, 1]} : vector<10x96xf32> to vector<10x16xf32>
    %c0_83 = arith.constant 0 : index
    %c32 = arith.constant 32 : index
    %148 = vector.load %arg17[%c0_83, %c32] : memref<20x48xf32, #tpu.memory_space<vmem>>, vector<10x16xf32>
    tpu.vector_store %arg17[%c0_83, %c32], %147 {strides = array<i32>} : memref<20x48xf32, #tpu.memory_space<vmem>>, vector<10x16xf32>,
    %149 = vector.extract_strided_slice %142 {offsets = [0, 16], sizes = [10, 16], strides = [1, 1]} : vector<10x96xf32> to vector<10x16xf32>
    %c10 = arith.constant 10 : index
    %c0_84 = arith.constant 0 : index
    %150 = vector.load %arg17[%c10, %c0_84] : memref<20x48xf32, #tpu.memory_space<vmem>>, vector<10x16xf32>
    tpu.vector_store %arg17[%c10, %c0_84], %149 {strides = array<i32>} : memref<20x48xf32, #tpu.memory_space<vmem>>, vector<10x16xf32>,
    %151 = vector.extract_strided_slice %142 {offsets = [0, 48], sizes = [10, 16], strides = [1, 1]} : vector<10x96xf32> to vector<10x16xf32>
    %c10_85 = arith.constant 10 : index
    %c16_86 = arith.constant 16 : index
    %152 = vector.load %arg17[%c10_85, %c16_86] : memref<20x48xf32, #tpu.memory_space<vmem>>, vector<10x16xf32>
    tpu.vector_store %arg17[%c10_85, %c16_86], %151 {strides = array<i32>} : memref<20x48xf32, #tpu.memory_space<vmem>>, vector<10x16xf32>,
    %153 = vector.extract_strided_slice %142 {offsets = [0, 80], sizes = [10, 16], strides = [1, 1]} : vector<10x96xf32> to vector<10x16xf32>
    %c10_87 = arith.constant 10 : index
    %c32_88 = arith.constant 32 : index
    %154 = vector.load %arg17[%c10_87, %c32_88] : memref<20x48xf32, #tpu.memory_space<vmem>>, vector<10x16xf32>
    tpu.vector_store %arg17[%c10_87, %c32_88], %153 {strides = array<i32>} : memref<20x48xf32, #tpu.memory_space<vmem>>, vector<10x16xf32>,
    %c0_89 = arith.constant 0 : index
    %c0_90 = arith.constant 0 : index
    %155 = vector.load %arg17[%c0_89, %c0_90] : memref<20x48xf32, #tpu.memory_space<vmem>>, vector<20x16xf32>
    %c0_91 = arith.constant 0 : index
    %c16_92 = arith.constant 16 : index
    %156 = vector.load %arg17[%c0_91, %c16_92] : memref<20x48xf32, #tpu.memory_space<vmem>>, vector<20x16xf32>
    %c0_93 = arith.constant 0 : index
    %c32_94 = arith.constant 32 : index
    %157 = vector.load %arg17[%c0_93, %c32_94] : memref<20x48xf32, #tpu.memory_space<vmem>>, vector<20x16xf32>
    %158 = arith.truncf %155 : vector<20x16xf32> to vector<20x16xbf16>
    %159 = arith.truncf %156 : vector<20x16xf32> to vector<20x16xbf16>
    %cst_95 = arith.constant dense<0.000000e+00> : vector<20x20xf32>
    %160 = tpu.matmul %158, %159, %cst_95 {dimension_numbers = #tpu.dot_dimension_numbers<[1], [1], [0], [0], [0, 0, 1, 0], [], []>} : vector<20x16xbf16>, vector<20x16xbf16>, vector<20x20xf32> -> vector<20x20xf32>
    %cst_96 = arith.constant 2.500000e-01 : f32
    %161 = vector.broadcast %cst_96 : f32 to vector<20x20xf32>
    %162 = arith.mulf %160, %161 : vector<20x20xf32>
    %163 = arith.addf %162, %113 : vector<20x20xf32>
    %cst_97 = arith.constant dense<0xFF800000> : vector<20xf32>
    %164 = vector.multi_reduction <maximumf>, %163, %cst_97 [1] : vector<20x20xf32> to vector<20xf32>
    %165 = vector.shape_cast %164 : vector<20xf32> to vector<20x1xf32>
    %166 = vector.broadcast %165 : vector<20x1xf32> to vector<20x20xf32>
    %167 = arith.subf %163, %166 : vector<20x20xf32>
    %168 = math.exp %167 : vector<20x20xf32>
    %cst_98 = arith.constant dense<0.000000e+00> : vector<20xf32>
    %169 = vector.multi_reduction <add>, %168, %cst_98 [1] : vector<20x20xf32> to vector<20xf32>
    %170 = vector.shape_cast %169 : vector<20xf32> to vector<20x1xf32>
    %171 = tpu.reciprocal %170 {approx = true} : vector<20x1xf32> -> vector<20x1xf32>
    %172 = vector.broadcast %171 : vector<20x1xf32> to vector<20x20xf32>
    %173 = arith.mulf %168, %172 : vector<20x20xf32>
    %174 = arith.truncf %173 : vector<20x20xf32> to vector<20x20xbf16>
    %175 = arith.truncf %157 : vector<20x16xf32> to vector<20x16xbf16>
    %cst_99 = arith.constant dense<0.000000e+00> : vector<20x16xf32>
    %176 = tpu.matmul %174, %175, %cst_99 {dimension_numbers = #tpu.dot_dimension_numbers<[1], [0], [0], [1], [0, 0, 1, 1], [], []>} : vector<20x20xbf16>, vector<20x16xbf16>, vector<20x16xf32> -> vector<20x16xf32>
    %177 = vector.extract_strided_slice %176 {offsets = [0, 0], sizes = [10, 16], strides = [1, 1]} : vector<20x16xf32> to vector<10x16xf32>
    %c0_100 = arith.constant 0 : index
    %c0_101 = arith.constant 0 : index
    %178 = vector.load %arg18[%c0_100, %c0_101] : memref<10x32xf32, #tpu.memory_space<vmem>>, vector<10x16xf32>
    tpu.vector_store %arg18[%c0_100, %c0_101], %177 {strides = array<i32>} : memref<10x32xf32, #tpu.memory_space<vmem>>, vector<10x16xf32>,
    %179 = vector.extract_strided_slice %176 {offsets = [10, 0], sizes = [10, 16], strides = [1, 1]} : vector<20x16xf32> to vector<10x16xf32>
    %c0_102 = arith.constant 0 : index
    %c16_103 = arith.constant 16 : index
    %180 = vector.load %arg18[%c0_102, %c16_103] : memref<10x32xf32, #tpu.memory_space<vmem>>, vector<10x16xf32>
    tpu.vector_store %arg18[%c0_102, %c16_103], %179 {strides = array<i32>} : memref<10x32xf32, #tpu.memory_space<vmem>>, vector<10x16xf32>,
    %c0_104 = arith.constant 0 : index
    %c0_105 = arith.constant 0 : index
    %181 = vector.load %arg18[%c0_104, %c0_105] : memref<10x32xf32, #tpu.memory_space<vmem>>, vector<10x32xf32>
    %182 = arith.truncf %181 : vector<10x32xf32> to vector<10x32xbf16>
    %183 = arith.index_cast %c0_i32_67 : i32 to index
    %c0_106 = arith.constant 0 : index
    %c0_107 = arith.constant 0 : index
    %184 = vector.load %arg7[%183, %c0_106, %c0_107] : memref<2x32x32xbf16, #tpu.memory_space<vmem>>, vector<1x32x32xbf16>
    %185 = vector.shape_cast %184 : vector<1x32x32xbf16> to vector<32x32xbf16>
    %cst_108 = arith.constant dense<0.000000e+00> : vector<10x32xf32>
    %186 = tpu.matmul %182, %185, %cst_108 {dimension_numbers = #tpu.dot_dimension_numbers<[1], [0], [0], [1], [0, 0, 1, 1], [], []>} : vector<10x32xbf16>, vector<32x32xbf16>, vector<10x32xf32> -> vector<10x32xf32>
    %187 = arith.index_cast %c0_i32_67 : i32 to index
    %c0_109 = arith.constant 0 : index
    %c0_110 = arith.constant 0 : index
    %188 = vector.load %arg8[%187, %c0_109, %c0_110] : memref<2x1x32xf32, #tpu.memory_space<vmem>>, vector<1x1x32xf32>
    %189 = vector.shape_cast %188 : vector<1x1x32xf32> to vector<1x32xf32>
    %190 = vector.broadcast %189 : vector<1x32xf32> to vector<10x32xf32>
    %191 = arith.addf %186, %190 : vector<10x32xf32>
    %192 = arith.addf %114, %191 : vector<10x32xf32>
    %cst_111 = arith.constant dense<0.000000e+00> : vector<10xf32>
    %193 = vector.multi_reduction <add>, %192, %cst_111 [1] : vector<10x32xf32> to vector<10xf32>
    %194 = vector.shape_cast %193 : vector<10xf32> to vector<10x1xf32>
    %cst_112 = arith.constant 3.200000e+01 : f32
    %195 = vector.broadcast %cst_112 : f32 to vector<10x1xf32>
    %196 = arith.divf %194, %195 : vector<10x1xf32>
    %197 = vector.broadcast %196 : vector<10x1xf32> to vector<10x32xf32>
    %198 = arith.subf %192, %197 : vector<10x32xf32>
    %199 = arith.mulf %198, %198 : vector<10x32xf32>
    %cst_113 = arith.constant dense<0.000000e+00> : vector<10xf32>
    %200 = vector.multi_reduction <add>, %199, %cst_113 [1] : vector<10x32xf32> to vector<10xf32>
    %201 = vector.shape_cast %200 : vector<10xf32> to vector<10x1xf32>
    %cst_114 = arith.constant 3.200000e+01 : f32
    %202 = vector.broadcast %cst_114 : f32 to vector<10x1xf32>
    %203 = arith.divf %201, %202 : vector<10x1xf32>
    %204 = vector.broadcast %196 : vector<10x1xf32> to vector<10x32xf32>
    %205 = arith.subf %192, %204 : vector<10x32xf32>
    %cst_115 = arith.constant 9.99999997E-7 : f32
    %206 = vector.broadcast %cst_115 : f32 to vector<10x1xf32>
    %207 = arith.addf %203, %206 : vector<10x1xf32>
    %208 = math.rsqrt %207 : vector<10x1xf32>
    %209 = vector.broadcast %208 : vector<10x1xf32> to vector<10x32xf32>
    %210 = arith.mulf %205, %209 : vector<10x32xf32>
    %211 = arith.truncf %210 : vector<10x32xf32> to vector<10x32xbf16>
    %212 = arith.index_cast %c0_i32_67 : i32 to index
    %c0_116 = arith.constant 0 : index
    %c0_117 = arith.constant 0 : index
    %213 = vector.load %arg9[%212, %c0_116, %c0_117] : memref<2x32x64xbf16, #tpu.memory_space<vmem>>, vector<1x32x64xbf16>
    %214 = vector.shape_cast %213 : vector<1x32x64xbf16> to vector<32x64xbf16>
    %cst_118 = arith.constant dense<0.000000e+00> : vector<10x64xf32>
    %215 = tpu.matmul %211, %214, %cst_118 {dimension_numbers = #tpu.dot_dimension_numbers<[1], [0], [0], [1], [0, 0, 1, 1], [], []>} : vector<10x32xbf16>, vector<32x64xbf16>, vector<10x64xf32> -> vector<10x64xf32>
    %216 = arith.index_cast %c0_i32_67 : i32 to index
    %c0_119 = arith.constant 0 : index
    %c0_120 = arith.constant 0 : index
    %217 = vector.load %arg10[%216, %c0_119, %c0_120] : memref<2x1x64xf32, #tpu.memory_space<vmem>>, vector<1x1x64xf32>
    %218 = vector.shape_cast %217 : vector<1x1x64xf32> to vector<1x64xf32>
    %219 = vector.broadcast %218 : vector<1x64xf32> to vector<10x64xf32>
    %220 = arith.addf %215, %219 : vector<10x64xf32>
    %cst_121 = arith.constant 0.707106769 : f32
    %221 = vector.broadcast %cst_121 : f32 to vector<10x64xf32>
    %222 = arith.mulf %220, %221 : vector<10x64xf32>
    %223 = math.absf %222 : vector<10x64xf32>
    %cst_122 = arith.constant 0.327591091 : f32
    %224 = vector.broadcast %cst_122 : f32 to vector<10x64xf32>
    %225 = arith.mulf %224, %223 : vector<10x64xf32>
    %cst_123 = arith.constant 1.000000e+00 : f32
    %226 = vector.broadcast %cst_123 : f32 to vector<10x64xf32>
    %227 = arith.addf %226, %225 : vector<10x64xf32>
    %cst_124 = arith.constant 1.000000e+00 : f32
    %228 = vector.broadcast %cst_124 : f32 to vector<10x64xf32>
    %229 = arith.divf %228, %227 : vector<10x64xf32>
    %cst_125 = arith.constant 1.06140542 : f32
    %230 = vector.broadcast %cst_125 : f32 to vector<10x64xf32>
    %231 = arith.mulf %230, %229 : vector<10x64xf32>
    %cst_126 = arith.constant -1.45315206 : f32
    %232 = vector.broadcast %cst_126 : f32 to vector<10x64xf32>
    %233 = arith.addf %231, %232 : vector<10x64xf32>
    %234 = arith.mulf %233, %229 : vector<10x64xf32>
    %cst_127 = arith.constant 1.42141378 : f32
    %235 = vector.broadcast %cst_127 : f32 to vector<10x64xf32>
    %236 = arith.addf %234, %235 : vector<10x64xf32>
    %237 = arith.mulf %236, %229 : vector<10x64xf32>
    %cst_128 = arith.constant -0.284496725 : f32
    %238 = vector.broadcast %cst_128 : f32 to vector<10x64xf32>
    %239 = arith.addf %237, %238 : vector<10x64xf32>
    %240 = arith.mulf %239, %229 : vector<10x64xf32>
    %cst_129 = arith.constant 0.254829586 : f32
    %241 = vector.broadcast %cst_129 : f32 to vector<10x64xf32>
    %242 = arith.addf %240, %241 : vector<10x64xf32>
    %243 = arith.mulf %242, %229 : vector<10x64xf32>
    %cst_130 = arith.constant 0.000000e+00 : f32
    %244 = vector.broadcast %cst_130 : f32 to vector<10x64xf32>
    %245 = arith.subf %244, %223 : vector<10x64xf32>
    %246 = arith.mulf %245, %223 : vector<10x64xf32>
    %247 = math.exp %246 : vector<10x64xf32>
    %248 = arith.mulf %243, %247 : vector<10x64xf32>
    %cst_131 = arith.constant 1.000000e+00 : f32
    %249 = vector.broadcast %cst_131 : f32 to vector<10x64xf32>
    %250 = arith.subf %249, %248 : vector<10x64xf32>
    %cst_132 = arith.constant 0.000000e+00 : f32
    %251 = vector.broadcast %cst_132 : f32 to vector<10x64xf32>
    %252 = arith.cmpf oge, %222, %251 : vector<10x64xf32>
    %cst_133 = arith.constant 0.000000e+00 : f32
    %253 = vector.broadcast %cst_133 : f32 to vector<10x64xf32>
    %254 = arith.subf %253, %250 : vector<10x64xf32>
    %255 = arith.select %252, %250, %254 : vector<10x64xi1>, vector<10x64xf32>
    %cst_134 = arith.constant 5.000000e-01 : f32
    %256 = vector.broadcast %cst_134 : f32 to vector<10x64xf32>
    %257 = arith.mulf %256, %220 : vector<10x64xf32>
    %cst_135 = arith.constant 1.000000e+00 : f32
    %258 = vector.broadcast %cst_135 : f32 to vector<10x64xf32>
    %259 = arith.addf %258, %255 : vector<10x64xf32>
    %260 = arith.mulf %257, %259 : vector<10x64xf32>
    %261 = arith.truncf %260 : vector<10x64xf32> to vector<10x64xbf16>
    %262 = arith.index_cast %c0_i32_67 : i32 to index
    %c0_136 = arith.constant 0 : index
    %c0_137 = arith.constant 0 : index
    %263 = vector.load %arg11[%262, %c0_136, %c0_137] : memref<2x64x32xbf16, #tpu.memory_space<vmem>>, vector<1x64x32xbf16>
    %264 = vector.shape_cast %263 : vector<1x64x32xbf16> to vector<64x32xbf16>
    %cst_138 = arith.constant dense<0.000000e+00> : vector<10x32xf32>
    %265 = tpu.matmul %261, %264, %cst_138 {dimension_numbers = #tpu.dot_dimension_numbers<[1], [0], [0], [1], [0, 0, 1, 1], [], []>} : vector<10x64xbf16>, vector<64x32xbf16>, vector<10x32xf32> -> vector<10x32xf32>
    %266 = arith.index_cast %c0_i32_67 : i32 to index
    %c0_139 = arith.constant 0 : index
    %c0_140 = arith.constant 0 : index
    %267 = vector.load %arg12[%266, %c0_139, %c0_140] : memref<2x1x32xf32, #tpu.memory_space<vmem>>, vector<1x1x32xf32>
    %268 = vector.shape_cast %267 : vector<1x1x32xf32> to vector<1x32xf32>
    %269 = vector.broadcast %268 : vector<1x32xf32> to vector<10x32xf32>
    %270 = arith.addf %265, %269 : vector<10x32xf32>
    %271 = arith.addf %192, %270 : vector<10x32xf32>
    %c0_141 = arith.constant 0 : index
    %c0_142 = arith.constant 0 : index
    %272 = vector.load %arg16[%c0_141, %c0_142] : memref<10x32xf32, #tpu.memory_space<vmem>>, vector<10x32xf32>
    tpu.vector_store %arg16[%c0_141, %c0_142], %271 {strides = array<i32>} : memref<10x32xf32, #tpu.memory_space<vmem>>, vector<10x32xf32>,
    %c1_i32 = arith.constant 1 : i32
    %c0_143 = arith.constant 0 : index
    %c0_144 = arith.constant 0 : index
    %273 = vector.load %arg16[%c0_143, %c0_144] : memref<10x32xf32, #tpu.memory_space<vmem>>, vector<10x32xf32>
    %cst_145 = arith.constant dense<0.000000e+00> : vector<10xf32>
    %274 = vector.multi_reduction <add>, %273, %cst_145 [1] : vector<10x32xf32> to vector<10xf32>
    %275 = vector.shape_cast %274 : vector<10xf32> to vector<10x1xf32>
    %cst_146 = arith.constant 3.200000e+01 : f32
    %276 = vector.broadcast %cst_146 : f32 to vector<10x1xf32>
    %277 = arith.divf %275, %276 : vector<10x1xf32>
    %278 = vector.broadcast %277 : vector<10x1xf32> to vector<10x32xf32>
    %279 = arith.subf %273, %278 : vector<10x32xf32>
    %280 = arith.mulf %279, %279 : vector<10x32xf32>
    %cst_147 = arith.constant dense<0.000000e+00> : vector<10xf32>
    %281 = vector.multi_reduction <add>, %280, %cst_147 [1] : vector<10x32xf32> to vector<10xf32>
    %282 = vector.shape_cast %281 : vector<10xf32> to vector<10x1xf32>
    %cst_148 = arith.constant 3.200000e+01 : f32
    %283 = vector.broadcast %cst_148 : f32 to vector<10x1xf32>
    %284 = arith.divf %282, %283 : vector<10x1xf32>
    %285 = vector.broadcast %277 : vector<10x1xf32> to vector<10x32xf32>
    %286 = arith.subf %273, %285 : vector<10x32xf32>
    %cst_149 = arith.constant 9.99999997E-7 : f32
    %287 = vector.broadcast %cst_149 : f32 to vector<10x1xf32>
    %288 = arith.addf %284, %287 : vector<10x1xf32>
    %289 = math.rsqrt %288 : vector<10x1xf32>
    %290 = vector.broadcast %289 : vector<10x1xf32> to vector<10x32xf32>
    %291 = arith.mulf %286, %290 : vector<10x32xf32>
    %292 = arith.truncf %291 : vector<10x32xf32> to vector<10x32xbf16>
    %293 = arith.index_cast %c1_i32 : i32 to index
    %c0_150 = arith.constant 0 : index
    %c0_151 = arith.constant 0 : index
    %294 = vector.load %arg5[%293, %c0_150, %c0_151] : memref<2x32x96xbf16, #tpu.memory_space<vmem>>, vector<1x32x96xbf16>
    %295 = vector.shape_cast %294 : vector<1x32x96xbf16> to vector<32x96xbf16>
    %cst_152 = arith.constant dense<0.000000e+00> : vector<10x96xf32>
    %296 = tpu.matmul %292, %295, %cst_152 {dimension_numbers = #tpu.dot_dimension_numbers<[1], [0], [0], [1], [0, 0, 1, 1], [], []>} : vector<10x32xbf16>, vector<32x96xbf16>, vector<10x96xf32> -> vector<10x96xf32>
    %297 = arith.index_cast %c1_i32 : i32 to index
    %c0_153 = arith.constant 0 : index
    %c0_154 = arith.constant 0 : index
    %298 = vector.load %arg6[%297, %c0_153, %c0_154] : memref<2x1x96xf32, #tpu.memory_space<vmem>>, vector<1x1x96xf32>
    %299 = vector.shape_cast %298 : vector<1x1x96xf32> to vector<1x96xf32>
    %300 = vector.broadcast %299 : vector<1x96xf32> to vector<10x96xf32>
    %301 = arith.addf %296, %300 : vector<10x96xf32>
    %302 = vector.extract_strided_slice %301 {offsets = [0, 0], sizes = [10, 16], strides = [1, 1]} : vector<10x96xf32> to vector<10x16xf32>
    %c0_155 = arith.constant 0 : index
    %c0_156 = arith.constant 0 : index
    %303 = vector.load %arg17[%c0_155, %c0_156] : memref<20x48xf32, #tpu.memory_space<vmem>>, vector<10x16xf32>
    tpu.vector_store %arg17[%c0_155, %c0_156], %302 {strides = array<i32>} : memref<20x48xf32, #tpu.memory_space<vmem>>, vector<10x16xf32>,
    %304 = vector.extract_strided_slice %301 {offsets = [0, 32], sizes = [10, 16], strides = [1, 1]} : vector<10x96xf32> to vector<10x16xf32>
    %c0_157 = arith.constant 0 : index
    %c16_158 = arith.constant 16 : index
    %305 = vector.load %arg17[%c0_157, %c16_158] : memref<20x48xf32, #tpu.memory_space<vmem>>, vector<10x16xf32>
    tpu.vector_store %arg17[%c0_157, %c16_158], %304 {strides = array<i32>} : memref<20x48xf32, #tpu.memory_space<vmem>>, vector<10x16xf32>,
    %306 = vector.extract_strided_slice %301 {offsets = [0, 64], sizes = [10, 16], strides = [1, 1]} : vector<10x96xf32> to vector<10x16xf32>
    %c0_159 = arith.constant 0 : index
    %c32_160 = arith.constant 32 : index
    %307 = vector.load %arg17[%c0_159, %c32_160] : memref<20x48xf32, #tpu.memory_space<vmem>>, vector<10x16xf32>
    tpu.vector_store %arg17[%c0_159, %c32_160], %306 {strides = array<i32>} : memref<20x48xf32, #tpu.memory_space<vmem>>, vector<10x16xf32>,
    %308 = vector.extract_strided_slice %301 {offsets = [0, 16], sizes = [10, 16], strides = [1, 1]} : vector<10x96xf32> to vector<10x16xf32>
    %c10_161 = arith.constant 10 : index
    %c0_162 = arith.constant 0 : index
    %309 = vector.load %arg17[%c10_161, %c0_162] : memref<20x48xf32, #tpu.memory_space<vmem>>, vector<10x16xf32>
    tpu.vector_store %arg17[%c10_161, %c0_162], %308 {strides = array<i32>} : memref<20x48xf32, #tpu.memory_space<vmem>>, vector<10x16xf32>,
    %310 = vector.extract_strided_slice %301 {offsets = [0, 48], sizes = [10, 16], strides = [1, 1]} : vector<10x96xf32> to vector<10x16xf32>
    %c10_163 = arith.constant 10 : index
    %c16_164 = arith.constant 16 : index
    %311 = vector.load %arg17[%c10_163, %c16_164] : memref<20x48xf32, #tpu.memory_space<vmem>>, vector<10x16xf32>
    tpu.vector_store %arg17[%c10_163, %c16_164], %310 {strides = array<i32>} : memref<20x48xf32, #tpu.memory_space<vmem>>, vector<10x16xf32>,
    %312 = vector.extract_strided_slice %301 {offsets = [0, 80], sizes = [10, 16], strides = [1, 1]} : vector<10x96xf32> to vector<10x16xf32>
    %c10_165 = arith.constant 10 : index
    %c32_166 = arith.constant 32 : index
    %313 = vector.load %arg17[%c10_165, %c32_166] : memref<20x48xf32, #tpu.memory_space<vmem>>, vector<10x16xf32>
    tpu.vector_store %arg17[%c10_165, %c32_166], %312 {strides = array<i32>} : memref<20x48xf32, #tpu.memory_space<vmem>>, vector<10x16xf32>,
    %c0_167 = arith.constant 0 : index
    %c0_168 = arith.constant 0 : index
    %314 = vector.load %arg17[%c0_167, %c0_168] : memref<20x48xf32, #tpu.memory_space<vmem>>, vector<20x16xf32>
    %c0_169 = arith.constant 0 : index
    %c16_170 = arith.constant 16 : index
    %315 = vector.load %arg17[%c0_169, %c16_170] : memref<20x48xf32, #tpu.memory_space<vmem>>, vector<20x16xf32>
    %c0_171 = arith.constant 0 : index
    %c32_172 = arith.constant 32 : index
    %316 = vector.load %arg17[%c0_171, %c32_172] : memref<20x48xf32, #tpu.memory_space<vmem>>, vector<20x16xf32>
    %317 = arith.truncf %314 : vector<20x16xf32> to vector<20x16xbf16>
    %318 = arith.truncf %315 : vector<20x16xf32> to vector<20x16xbf16>
    %cst_173 = arith.constant dense<0.000000e+00> : vector<20x20xf32>
    %319 = tpu.matmul %317, %318, %cst_173 {dimension_numbers = #tpu.dot_dimension_numbers<[1], [1], [0], [0], [0, 0, 1, 0], [], []>} : vector<20x16xbf16>, vector<20x16xbf16>, vector<20x20xf32> -> vector<20x20xf32>
    %cst_174 = arith.constant 2.500000e-01 : f32
    %320 = vector.broadcast %cst_174 : f32 to vector<20x20xf32>
    %321 = arith.mulf %319, %320 : vector<20x20xf32>
    %322 = arith.addf %321, %113 : vector<20x20xf32>
    %cst_175 = arith.constant dense<0xFF800000> : vector<20xf32>
    %323 = vector.multi_reduction <maximumf>, %322, %cst_175 [1] : vector<20x20xf32> to vector<20xf32>
    %324 = vector.shape_cast %323 : vector<20xf32> to vector<20x1xf32>
    %325 = vector.broadcast %324 : vector<20x1xf32> to vector<20x20xf32>
    %326 = arith.subf %322, %325 : vector<20x20xf32>
    %327 = math.exp %326 : vector<20x20xf32>
    %cst_176 = arith.constant dense<0.000000e+00> : vector<20xf32>
    %328 = vector.multi_reduction <add>, %327, %cst_176 [1] : vector<20x20xf32> to vector<20xf32>
    %329 = vector.shape_cast %328 : vector<20xf32> to vector<20x1xf32>
    %330 = tpu.reciprocal %329 {approx = true} : vector<20x1xf32> -> vector<20x1xf32>
    %331 = vector.broadcast %330 : vector<20x1xf32> to vector<20x20xf32>
    %332 = arith.mulf %327, %331 : vector<20x20xf32>
    %333 = arith.truncf %332 : vector<20x20xf32> to vector<20x20xbf16>
    %334 = arith.truncf %316 : vector<20x16xf32> to vector<20x16xbf16>
    %cst_177 = arith.constant dense<0.000000e+00> : vector<20x16xf32>
    %335 = tpu.matmul %333, %334, %cst_177 {dimension_numbers = #tpu.dot_dimension_numbers<[1], [0], [0], [1], [0, 0, 1, 1], [], []>} : vector<20x20xbf16>, vector<20x16xbf16>, vector<20x16xf32> -> vector<20x16xf32>
    %336 = vector.extract_strided_slice %335 {offsets = [0, 0], sizes = [10, 16], strides = [1, 1]} : vector<20x16xf32> to vector<10x16xf32>
    %c0_178 = arith.constant 0 : index
    %c0_179 = arith.constant 0 : index
    %337 = vector.load %arg18[%c0_178, %c0_179] : memref<10x32xf32, #tpu.memory_space<vmem>>, vector<10x16xf32>
    tpu.vector_store %arg18[%c0_178, %c0_179], %336 {strides = array<i32>} : memref<10x32xf32, #tpu.memory_space<vmem>>, vector<10x16xf32>,
    %338 = vector.extract_strided_slice %335 {offsets = [10, 0], sizes = [10, 16], strides = [1, 1]} : vector<20x16xf32> to vector<10x16xf32>
    %c0_180 = arith.constant 0 : index
    %c16_181 = arith.constant 16 : index
    %339 = vector.load %arg18[%c0_180, %c16_181] : memref<10x32xf32, #tpu.memory_space<vmem>>, vector<10x16xf32>
    tpu.vector_store %arg18[%c0_180, %c16_181], %338 {strides = array<i32>} : memref<10x32xf32, #tpu.memory_space<vmem>>, vector<10x16xf32>,
    %c0_182 = arith.constant 0 : index
    %c0_183 = arith.constant 0 : index
    %340 = vector.load %arg18[%c0_182, %c0_183] : memref<10x32xf32, #tpu.memory_space<vmem>>, vector<10x32xf32>
    %341 = arith.truncf %340 : vector<10x32xf32> to vector<10x32xbf16>
    %342 = arith.index_cast %c1_i32 : i32 to index
    %c0_184 = arith.constant 0 : index
    %c0_185 = arith.constant 0 : index
    %343 = vector.load %arg7[%342, %c0_184, %c0_185] : memref<2x32x32xbf16, #tpu.memory_space<vmem>>, vector<1x32x32xbf16>
    %344 = vector.shape_cast %343 : vector<1x32x32xbf16> to vector<32x32xbf16>
    %cst_186 = arith.constant dense<0.000000e+00> : vector<10x32xf32>
    %345 = tpu.matmul %341, %344, %cst_186 {dimension_numbers = #tpu.dot_dimension_numbers<[1], [0], [0], [1], [0, 0, 1, 1], [], []>} : vector<10x32xbf16>, vector<32x32xbf16>, vector<10x32xf32> -> vector<10x32xf32>
    %346 = arith.index_cast %c1_i32 : i32 to index
    %c0_187 = arith.constant 0 : index
    %c0_188 = arith.constant 0 : index
    %347 = vector.load %arg8[%346, %c0_187, %c0_188] : memref<2x1x32xf32, #tpu.memory_space<vmem>>, vector<1x1x32xf32>
    %348 = vector.shape_cast %347 : vector<1x1x32xf32> to vector<1x32xf32>
    %349 = vector.broadcast %348 : vector<1x32xf32> to vector<10x32xf32>
    %350 = arith.addf %345, %349 : vector<10x32xf32>
    %351 = arith.addf %273, %350 : vector<10x32xf32>
    %cst_189 = arith.constant dense<0.000000e+00> : vector<10xf32>
    %352 = vector.multi_reduction <add>, %351, %cst_189 [1] : vector<10x32xf32> to vector<10xf32>
    %353 = vector.shape_cast %352 : vector<10xf32> to vector<10x1xf32>
    %cst_190 = arith.constant 3.200000e+01 : f32
    %354 = vector.broadcast %cst_190 : f32 to vector<10x1xf32>
    %355 = arith.divf %353, %354 : vector<10x1xf32>
    %356 = vector.broadcast %355 : vector<10x1xf32> to vector<10x32xf32>
    %357 = arith.subf %351, %356 : vector<10x32xf32>
    %358 = arith.mulf %357, %357 : vector<10x32xf32>
    %cst_191 = arith.constant dense<0.000000e+00> : vector<10xf32>
    %359 = vector.multi_reduction <add>, %358, %cst_191 [1] : vector<10x32xf32> to vector<10xf32>
    %360 = vector.shape_cast %359 : vector<10xf32> to vector<10x1xf32>
    %cst_192 = arith.constant 3.200000e+01 : f32
    %361 = vector.broadcast %cst_192 : f32 to vector<10x1xf32>
    %362 = arith.divf %360, %361 : vector<10x1xf32>
    %363 = vector.broadcast %355 : vector<10x1xf32> to vector<10x32xf32>
    %364 = arith.subf %351, %363 : vector<10x32xf32>
    %cst_193 = arith.constant 9.99999997E-7 : f32
    %365 = vector.broadcast %cst_193 : f32 to vector<10x1xf32>
    %366 = arith.addf %362, %365 : vector<10x1xf32>
    %367 = math.rsqrt %366 : vector<10x1xf32>
    %368 = vector.broadcast %367 : vector<10x1xf32> to vector<10x32xf32>
    %369 = arith.mulf %364, %368 : vector<10x32xf32>
    %370 = arith.truncf %369 : vector<10x32xf32> to vector<10x32xbf16>
    %371 = arith.index_cast %c1_i32 : i32 to index
    %c0_194 = arith.constant 0 : index
    %c0_195 = arith.constant 0 : index
    %372 = vector.load %arg9[%371, %c0_194, %c0_195] : memref<2x32x64xbf16, #tpu.memory_space<vmem>>, vector<1x32x64xbf16>
    %373 = vector.shape_cast %372 : vector<1x32x64xbf16> to vector<32x64xbf16>
    %cst_196 = arith.constant dense<0.000000e+00> : vector<10x64xf32>
    %374 = tpu.matmul %370, %373, %cst_196 {dimension_numbers = #tpu.dot_dimension_numbers<[1], [0], [0], [1], [0, 0, 1, 1], [], []>} : vector<10x32xbf16>, vector<32x64xbf16>, vector<10x64xf32> -> vector<10x64xf32>
    %375 = arith.index_cast %c1_i32 : i32 to index
    %c0_197 = arith.constant 0 : index
    %c0_198 = arith.constant 0 : index
    %376 = vector.load %arg10[%375, %c0_197, %c0_198] : memref<2x1x64xf32, #tpu.memory_space<vmem>>, vector<1x1x64xf32>
    %377 = vector.shape_cast %376 : vector<1x1x64xf32> to vector<1x64xf32>
    %378 = vector.broadcast %377 : vector<1x64xf32> to vector<10x64xf32>
    %379 = arith.addf %374, %378 : vector<10x64xf32>
    %cst_199 = arith.constant 0.707106769 : f32
    %380 = vector.broadcast %cst_199 : f32 to vector<10x64xf32>
    %381 = arith.mulf %379, %380 : vector<10x64xf32>
    %382 = math.absf %381 : vector<10x64xf32>
    %cst_200 = arith.constant 0.327591091 : f32
    %383 = vector.broadcast %cst_200 : f32 to vector<10x64xf32>
    %384 = arith.mulf %383, %382 : vector<10x64xf32>
    %cst_201 = arith.constant 1.000000e+00 : f32
    %385 = vector.broadcast %cst_201 : f32 to vector<10x64xf32>
    %386 = arith.addf %385, %384 : vector<10x64xf32>
    %cst_202 = arith.constant 1.000000e+00 : f32
    %387 = vector.broadcast %cst_202 : f32 to vector<10x64xf32>
    %388 = arith.divf %387, %386 : vector<10x64xf32>
    %cst_203 = arith.constant 1.06140542 : f32
    %389 = vector.broadcast %cst_203 : f32 to vector<10x64xf32>
    %390 = arith.mulf %389, %388 : vector<10x64xf32>
    %cst_204 = arith.constant -1.45315206 : f32
    %391 = vector.broadcast %cst_204 : f32 to vector<10x64xf32>
    %392 = arith.addf %390, %391 : vector<10x64xf32>
    %393 = arith.mulf %392, %388 : vector<10x64xf32>
    %cst_205 = arith.constant 1.42141378 : f32
    %394 = vector.broadcast %cst_205 : f32 to vector<10x64xf32>
    %395 = arith.addf %393, %394 : vector<10x64xf32>
    %396 = arith.mulf %395, %388 : vector<10x64xf32>
    %cst_206 = arith.constant -0.284496725 : f32
    %397 = vector.broadcast %cst_206 : f32 to vector<10x64xf32>
    %398 = arith.addf %396, %397 : vector<10x64xf32>
    %399 = arith.mulf %398, %388 : vector<10x64xf32>
    %cst_207 = arith.constant 0.254829586 : f32
    %400 = vector.broadcast %cst_207 : f32 to vector<10x64xf32>
    %401 = arith.addf %399, %400 : vector<10x64xf32>
    %402 = arith.mulf %401, %388 : vector<10x64xf32>
    %cst_208 = arith.constant 0.000000e+00 : f32
    %403 = vector.broadcast %cst_208 : f32 to vector<10x64xf32>
    %404 = arith.subf %403, %382 : vector<10x64xf32>
    %405 = arith.mulf %404, %382 : vector<10x64xf32>
    %406 = math.exp %405 : vector<10x64xf32>
    %407 = arith.mulf %402, %406 : vector<10x64xf32>
    %cst_209 = arith.constant 1.000000e+00 : f32
    %408 = vector.broadcast %cst_209 : f32 to vector<10x64xf32>
    %409 = arith.subf %408, %407 : vector<10x64xf32>
    %cst_210 = arith.constant 0.000000e+00 : f32
    %410 = vector.broadcast %cst_210 : f32 to vector<10x64xf32>
    %411 = arith.cmpf oge, %381, %410 : vector<10x64xf32>
    %cst_211 = arith.constant 0.000000e+00 : f32
    %412 = vector.broadcast %cst_211 : f32 to vector<10x64xf32>
    %413 = arith.subf %412, %409 : vector<10x64xf32>
    %414 = arith.select %411, %409, %413 : vector<10x64xi1>, vector<10x64xf32>
    %cst_212 = arith.constant 5.000000e-01 : f32
    %415 = vector.broadcast %cst_212 : f32 to vector<10x64xf32>
    %416 = arith.mulf %415, %379 : vector<10x64xf32>
    %cst_213 = arith.constant 1.000000e+00 : f32
    %417 = vector.broadcast %cst_213 : f32 to vector<10x64xf32>
    %418 = arith.addf %417, %414 : vector<10x64xf32>
    %419 = arith.mulf %416, %418 : vector<10x64xf32>
    %420 = arith.truncf %419 : vector<10x64xf32> to vector<10x64xbf16>
    %421 = arith.index_cast %c1_i32 : i32 to index
    %c0_214 = arith.constant 0 : index
    %c0_215 = arith.constant 0 : index
    %422 = vector.load %arg11[%421, %c0_214, %c0_215] : memref<2x64x32xbf16, #tpu.memory_space<vmem>>, vector<1x64x32xbf16>
    %423 = vector.shape_cast %422 : vector<1x64x32xbf16> to vector<64x32xbf16>
    %cst_216 = arith.constant dense<0.000000e+00> : vector<10x32xf32>
    %424 = tpu.matmul %420, %423, %cst_216 {dimension_numbers = #tpu.dot_dimension_numbers<[1], [0], [0], [1], [0, 0, 1, 1], [], []>} : vector<10x64xbf16>, vector<64x32xbf16>, vector<10x32xf32> -> vector<10x32xf32>
    %425 = arith.index_cast %c1_i32 : i32 to index
    %c0_217 = arith.constant 0 : index
    %c0_218 = arith.constant 0 : index
    %426 = vector.load %arg12[%425, %c0_217, %c0_218] : memref<2x1x32xf32, #tpu.memory_space<vmem>>, vector<1x1x32xf32>
    %427 = vector.shape_cast %426 : vector<1x1x32xf32> to vector<1x32xf32>
    %428 = vector.broadcast %427 : vector<1x32xf32> to vector<10x32xf32>
    %429 = arith.addf %424, %428 : vector<10x32xf32>
    %430 = arith.addf %351, %429 : vector<10x32xf32>
    %c0_219 = arith.constant 0 : index
    %c0_220 = arith.constant 0 : index
    %431 = vector.load %arg16[%c0_219, %c0_220] : memref<10x32xf32, #tpu.memory_space<vmem>>, vector<10x32xf32>
    tpu.vector_store %arg16[%c0_219, %c0_220], %430 {strides = array<i32>} : memref<10x32xf32, #tpu.memory_space<vmem>>, vector<10x32xf32>,
    %c2_i32 = arith.constant 2 : i32
    %c0_221 = arith.constant 0 : index
    %c0_222 = arith.constant 0 : index
    %432 = vector.load %arg16[%c0_221, %c0_222] : memref<10x32xf32, #tpu.memory_space<vmem>>, vector<10x32xf32>
    %cst_223 = arith.constant dense<0.000000e+00> : vector<10xf32>
    %433 = vector.multi_reduction <add>, %432, %cst_223 [1] : vector<10x32xf32> to vector<10xf32>
    %434 = vector.shape_cast %433 : vector<10xf32> to vector<10x1xf32>
    %cst_224 = arith.constant 3.200000e+01 : f32
    %435 = vector.broadcast %cst_224 : f32 to vector<10x1xf32>
    %436 = arith.divf %434, %435 : vector<10x1xf32>
    %437 = vector.broadcast %436 : vector<10x1xf32> to vector<10x32xf32>
    %438 = arith.subf %432, %437 : vector<10x32xf32>
    %439 = arith.mulf %438, %438 : vector<10x32xf32>
    %cst_225 = arith.constant dense<0.000000e+00> : vector<10xf32>
    %440 = vector.multi_reduction <add>, %439, %cst_225 [1] : vector<10x32xf32> to vector<10xf32>
    %441 = vector.shape_cast %440 : vector<10xf32> to vector<10x1xf32>
    %cst_226 = arith.constant 3.200000e+01 : f32
    %442 = vector.broadcast %cst_226 : f32 to vector<10x1xf32>
    %443 = arith.divf %441, %442 : vector<10x1xf32>
    %444 = vector.broadcast %436 : vector<10x1xf32> to vector<10x32xf32>
    %445 = arith.subf %432, %444 : vector<10x32xf32>
    %cst_227 = arith.constant 9.99999997E-7 : f32
    %446 = vector.broadcast %cst_227 : f32 to vector<10x1xf32>
    %447 = arith.addf %443, %446 : vector<10x1xf32>
    %448 = math.rsqrt %447 : vector<10x1xf32>
    %449 = vector.broadcast %448 : vector<10x1xf32> to vector<10x32xf32>
    %450 = arith.mulf %445, %449 : vector<10x32xf32>
    %451 = arith.truncf %450 : vector<10x32xf32> to vector<10x32xbf16>
    %c0_228 = arith.constant 0 : index
    %c0_229 = arith.constant 0 : index
    %452 = vector.load %arg13[%c0_228, %c0_229] : memref<32x10xbf16, #tpu.memory_space<vmem>>, vector<32x10xbf16>
    %cst_230 = arith.constant dense<0.000000e+00> : vector<10x10xf32>
    %453 = tpu.matmul %451, %452, %cst_230 {dimension_numbers = #tpu.dot_dimension_numbers<[1], [0], [0], [1], [0, 0, 1, 1], [], []>} : vector<10x32xbf16>, vector<32x10xbf16>, vector<10x10xf32> -> vector<10x10xf32>
    %c0_231 = arith.constant 0 : index
    %c0_232 = arith.constant 0 : index
    %454 = vector.load %arg14[%c0_231, %c0_232] : memref<1x10xf32, #tpu.memory_space<vmem>>, vector<1x10xf32>
    %455 = vector.broadcast %454 : vector<1x10xf32> to vector<10x10xf32>
    %456 = arith.addf %453, %455 : vector<10x10xf32>
    %457 = vector.extract_strided_slice %456 {offsets = [0, 0], sizes = [1, 10], strides = [1, 1]} : vector<10x10xf32> to vector<1x10xf32>
    %c0_233 = arith.constant 0 : index
    %c0_234 = arith.constant 0 : index
    %458 = vector.load %arg15[%c0_233, %c0_234] : memref<2x10xf32, #tpu.memory_space<vmem>>, vector<1x10xf32>
    tpu.vector_store %arg15[%c0_233, %c0_234], %457 {strides = array<i32>} : memref<2x10xf32, #tpu.memory_space<vmem>>, vector<1x10xf32>,
    %459 = vector.extract_strided_slice %456 {offsets = [5, 0], sizes = [1, 10], strides = [1, 1]} : vector<10x10xf32> to vector<1x10xf32>
    %c1_235 = arith.constant 1 : index
    %c0_236 = arith.constant 0 : index
    %460 = vector.load %arg15[%c1_235, %c0_236] : memref<2x10xf32, #tpu.memory_space<vmem>>, vector<1x10xf32>
    tpu.vector_store %arg15[%c1_235, %c0_236], %459 {strides = array<i32>} : memref<2x10xf32, #tpu.memory_space<vmem>>, vector<1x10xf32>,
    return
  }
}

</mosaic_0001>

<bundles_post_ra>
// kernel: vit_forward.1
= control target key start
LH: loop header
LB: loop body
LE: loop exit
PB: predicated region body
PF: predicated region fallthrough
CT: control target
= control target key end

     0   :  { %20 = vsyncpa [#allocation6], 0  ;;  %s2984_s0 = inlined_call_operand.vmem [shape: f32[2,768], index: 0, kind: input, shape index: {}]   ;;  %s2985_s1 = inlined_call_operand.hbm [shape: bf16[768,128], index: 1, kind: input, shape index: {}]   ;;  %s2986_s2 = inlined_call_operand.vmem [shape: f32[1,32], index: 2, kind: input, shape index: {}]   ;;  %s2987_s3 = inlined_call_operand.vmem [shape: f32[1,32], index: 3, kind: input, shape index: {}]   ;;  %s2988_s4 = inlined_call_operand.vmem [shape: f32[5,32], index: 4, kind: input, shape index: {}]   ;;  %s2989_s5 = inlined_call_operand.vmem [shape: bf16[2,32,96], index: 5, kind: input, shape index: {}]   ;;  %s2990_s6 = inlined_call_operand.vmem [shape: f32[2,1,96], index: 6, kind: input, shape index: {}]   ;;  %s2991_s7 = inlined_call_operand.vmem [shape: bf16[2,32,32], index: 7, kind: input, shape index: {}]   ;;  %s2992_s8 = inlined_call_operand.vmem [shape: f32[2,1,32], index: 8, kind: input, shape index: {}]   ;;  %s2993_s9 = inlined_call_operand.vmem [shape: bf16[2,32,64], index: 9, kind: input, shape index: {}]   ;;  %s2994_s10 = inlined_call_operand.vmem [shape: f32[2,1,64], index: 10, kind: input, shape index: {}]   ;;  %s2995_s11 = inlined_call_operand.vmem [shape: bf16[2,64,32], index: 11, kind: input, shape index: {}]   ;;  %s2996_s12 = inlined_call_operand.vmem [shape: f32[2,1,32], index: 12, kind: input, shape index: {}]   ;;  %s2997_s13 = inlined_call_operand.vmem [shape: bf16[32,10], index: 13, kind: input, shape index: {}]   ;;  %s2998_s14 = inlined_call_operand.vmem [shape: f32[1,10], index: 14, kind: input, shape index: {}]   ;;  %s2999_s15 = inlined_call_operand.hbm [shape: f32[2,10], index: 15, kind: output, shape index: {}]  }
   0x1   :  { %21 = vsyncpa [#allocation7], 0  ;;  %s28_s20 = sshll.u32 %s2985_s1, 4  ;;  %s2451_s21 = smov [#allocation5]   ;;  %s29_s20 = int_to_ptr.hbm [resolvable:$true] %s28_s20 }
   0x2   :  { %s30_s22 = sshll.u32 %s2451_s21, 4  ;;  %s2452_s23 = smov 64   ;;  %s31_s22 = int_to_ptr.vmem [resolvable:$true] %s30_s22 }
   0x3   :  { %s2453_s24 = smov 4  }
   0x4   :  { %36 = dma.hbm_to_vmem [thread:$0]  %s29_s20, 6144, %s31_s22, [#allocation6], %s2452_s23, %s2452_s23, %s2453_s24  }
   0x5   :  { %2447 = dma.done.wait [#allocation6], 6144  }
   0x6   :  { %2448 = vsyncadd [#allocation6], 4294961152  ;;  %v2247_v0 = vld [vmem:[#allocation5 + $0x38] sm:$0xff]  ;;  %v2246_v2 = vld [vmem:[#allocation5 + $0x30] sm:$0xff]  ;;  %s2454_s17 = smov 96   ;;  %s2455_s18 = smov 32  }
   0x7   :  { %v2255_v1 = vld [vmem:[#allocation5 + $0x78] sm:$0xff]  ;;  %477 = vmatpush.bf16.msra.mxu0 %v2247_v0  ;;  %v2254_v3 = vld [vmem:[#allocation5 + $0x70] sm:$0xff]  ;;  %v2245_v8 = vld [vmem:[#allocation5 + $0x28] sm:$0xff]  ;;  %vm558_vm0 = vcmask 253952   ;;  %vm633_vm1 = vcmask 254977   ;;  %vm3004_vm2 = vcmask 254976  }
   0x8   :  { %490 = vmatpush.bf16.msra.mxu1 %v2255_v1  ;;  %v2263_v4 = vld [vmem:[#allocation5 + $0xb8] sm:$0xff]  ;;  %v2262_v6 = vld [vmem:[#allocation5 + $0xb0] sm:$0xff]  ;;  %v2253_v9 = vld [vmem:[#allocation5 + $0x68] sm:$0xff]  ;;  %vm3005_vm3 = vcmask 261120   ;;  %vm3007_vm11 = vcmask 130048   ;;  %s2457_s27 = smov 112  }
   0x9   :  { %v2271_v5 = vld [vmem:[#allocation5 + $0xf8] sm:$0xff]  ;;  %503 = vmatpush.bf16.msra.mxu2 %v2263_v4  ;;  %v2270_v7 = vld [vmem:[#allocation5 + $0xf0] sm:$0xff]  ;;  %v2261_v10 = vld [vmem:[#allocation5 + $0xa8] sm:$0xff]  ;;  %vm3006_vm12 = vcmask 123904   ;;  %s2458_s28 = smov 80   ;;  %vm3002_vm13 = vcmask 261248  }
   0xa   :  { %516 = vmatpush.bf16.msra.mxu3 %v2271_v5  ;;  %v2269_v11 = vld [vmem:[#allocation5 + $0xe8] sm:$0xff]  ;;  %v2244_v12 = vld [vmem:[#allocation5 + $0x20] sm:$0xff]  ;;  %v2243_v17 = vld [vmem:[#allocation5 + $0x18] sm:$0xff]  ;;  %vm3001_vm14 = vcmask 392448   ;;  %vm3003_vm15 = vcmask 255104   ;;  %s2460_s29 = smov 16  }
   0xb   :  { %478 = vmatpush.bf16.msra.mxu0 %v2246_v2  ;;  %v2252_v13 = vld [vmem:[#allocation5 + $0x60] sm:$0xff]  ;;  %v2251_v18 = vld [vmem:[#allocation5 + $0x58] sm:$0xff]  ;;  %v2242_v21 = vld [vmem:[#allocation5 + $0x10] sm:$0xff] }
   0xc   :  { %491 = vmatpush.bf16.msra.mxu1 %v2254_v3  ;;  %v68_v14 = vld [vmem:[%s2984_s0] sm:$0xff]  ;;  %v2259_v19 = vld [vmem:[#allocation5 + $0x98] sm:$0xff]  ;;  %v2250_v22 = vld [vmem:[#allocation5 + $0x50] sm:$0xff] }
   0xd   :  { %504 = vmatpush.bf16.msra.mxu2 %v2262_v6  ;;  %v2260_v15 = vld [vmem:[#allocation5 + $0xa0] sm:$0xff]  ;;  %72 = vst [vmem:[#allocation1] ss:$4 sm:$0xff] %v68_v14  ;;  %v2267_v20 = vld [vmem:[#allocation5 + $0xd8] sm:$0xff]  ;;  %v2258_v23 = vld [vmem:[#allocation5 + $0x90] sm:$0xff] }
   0xe   :  { %517 = vmatpush.bf16.msra.mxu3 %v2270_v7  ;;  %v2268_v16 = vld [vmem:[#allocation5 + $0xe0] sm:$0xff]  ;;  %v2266_v24 = vld [vmem:[#allocation5 + $0xd0] sm:$0xff]  ;;  %v2241_v25 = vld [vmem:[#allocation5 + $0x8] sm:$0xff] }
   0xf   :  { %479 = vmatpush.bf16.msra.mxu0 %v2245_v8  ;;  %v2321_v26 = vld [vmem:[%s2986_s2] ss:$0 sm:$0xff]  ;;  %v2249_v28 = vld [vmem:[#allocation5 + $0x48] sm:$0xff]  ;;  %v2279_v36 = vld [vmem:[#allocation5 + $0x138] sm:$0xff] }
  0x10   :  { %492 = vmatpush.bf16.msra.mxu1 %v2253_v9  ;;  %v2322_v27 = vld [vmem:[%s2986_s2] ss:$0 sm:$0xff]  ;;  %v69_v29 = vld [vmem:[%s2984_s0 + $0x8] sm:$0xf]  ;;  %604 = vrot.lane.b32.xlu1 %v2321_v26, %s2454_s17  ;;  %v2287_v37 = vld [vmem:[#allocation5 + $0x178] sm:$0xff] }
  0x11   :  { %505 = vmatpush.bf16.msra.mxu2 %v2261_v10  ;;  %v2257_v30 = vld [vmem:[#allocation5 + $0x88] sm:$0xff]  ;;  %568 = vrot.lane.b32.xlu0 %v2322_v27, %s2455_s18  ;;  %74 = vst [vmem:[#allocation1 + $0x20] ss:$4 sm:$0xff] %v69_v29  ;;  %v2240_v32 = vld [vmem:[#allocation5] sm:$0xff]  ;;  %v2278_v46 = vld [vmem:[#allocation5 + $0x130] sm:$0xff] }
  0x12   :  { %518 = vmatpush.bf16.msra.mxu3 %v2269_v11  ;;  %v2265_v31 = vld [vmem:[#allocation5 + $0xc8] sm:$0xff]  ;;  %v2248_v33 = vld [vmem:[#allocation5 + $0x40] sm:$0xff]  ;;  %v2286_v47 = vld [vmem:[#allocation5 + $0x170] sm:$0xff] }
  0x13   :  { %480 = vmatpush.bf16.msra.mxu0 %v2244_v12  ;;  %v2256_v38 = vld [vmem:[#allocation5 + $0x80] sm:$0xff]  ;;  %v2277_v51 = vld [vmem:[#allocation5 + $0x128] sm:$0xff]  ;;  %v2275_v58 = vld [vmem:[#allocation5 + $0x118] sm:$0xff] }
  0x14   :  { %493 = vmatpush.bf16.msra.mxu1 %v2252_v13  ;;  %v75_v34 = vld.sshfl [vmem:[#allocation1] sm:$0xff pattern:$0x73625140]  ;;  %v76_v35 = vld.sshfl [vmem:[#allocation1 + $0x8] sm:$0xff pattern:$0x73625140] }
  0x15   :  { %506 = vmatpush.bf16.msra.mxu2 %v2260_v15  ;;  %v2264_v39 = vld [vmem:[#allocation5 + $0xc0] sm:$0xff]  ;;  %v87_v40 = vpack.c.bf16 %v75_v34, %v75_v34  ;;  %v88_v41 = vpack.c.bf16 %v76_v35, %v76_v35  ;;  %v77_v42 = vld.sshfl [vmem:[#allocation1 + $0x10] sm:$0xff pattern:$0x73625140]  ;;  %v2285_v52 = vld [vmem:[#allocation5 + $0x168] sm:$0xff] }
  0x16   :  { %519 = vmatpush.bf16.msra.mxu3 %v2268_v16  ;;  %v78_v43 = vld.sshfl [vmem:[#allocation1 + $0x18] sm:$0xff pattern:$0x73625140]  ;;  %v2323_v44 = vld [vmem:[%s2986_s2] ss:$0 sm:$0xff]  ;;  %v89_v48 = vpack.c.bf16 %v77_v42, %v77_v42  ;;  %v2274_v0 = vld [vmem:[#allocation5 + $0x110] sm:$0xff] }
  0x17   :  { %481 = vmatpush.bf16.msra.mxu0 %v2243_v17  ;;  %v2324_v45 = vld [vmem:[%s2986_s2] ss:$0 sm:$0xff]  ;;  %v90_v49 = vpack.c.bf16 %v78_v43, %v78_v43  ;;  %v590_v55 = vld [vmem:[%s2988_s4 + $0x3] sm:$0x1]  ;;  %v572_v56 = vld [vmem:[%s2988_s4 + $0x2] sm:$0x1] }
  0x18   :  { %494 = vmatpush.bf16.msra.mxu1 %v2251_v18  ;;  %v2325_v50 = vld [vmem:[%s2986_s2] ss:$0 sm:$0xff]  ;;  %638 = vrot.lane.b32.xlu1 %v2323_v44, %s2455_s18  ;;  %v2283_v59 = vld [vmem:[#allocation5 + $0x158] sm:$0xff]  ;;  %v661_v60 = vld [vmem:[%s2988_s4 + $0x3] sm:$0x1] }
  0x19   :  { %507 = vmatpush.bf16.msra.mxu2 %v2259_v19  ;;  %586 = vrot.lane.b32.xlu0 %v2324_v45, %s2452_s23  ;;  %v2276_v53 = vld [vmem:[#allocation5 + $0x120] sm:$0xff]  ;;  %v663_v62 = vrot.slane %v661_v60, 7  ;;  %v2282_v1 = vld [vmem:[#allocation5 + $0x150] sm:$0xff]  ;;  %v2273_v3 = vld [vmem:[#allocation5 + $0x108] sm:$0xff] }
  0x1a   :  { %520 = vmatpush.bf16.msra.mxu3 %v2267_v20  ;;  %657 = vrot.lane.b32.xlu2 %v2325_v50, %s2452_s23  ;;  %v2284_v54 = vld [vmem:[#allocation5 + $0x160] sm:$0xff]  ;;  %v2281_v4 = vld [vmem:[#allocation5 + $0x148] sm:$0xff] }
  0x1b   :  { %482 = vmatpush.bf16.msra.mxu0 %v2242_v21  ;;  %v2326_v57 = vld [vmem:[%s2986_s2] ss:$0 sm:$0xff]  ;;  %v642_v61 = vld [vmem:[%s2988_s4 + $0x2] sm:$0x1]  ;;  %v608_v2 = vld [vmem:[%s2988_s4 + $0x4] sm:$0x1] }
  0x1c   :  { %495 = vmatpush.bf16.msra.mxu1 %v2250_v22  ;;  %v644_v63 = vrot.slane %v642_v61, 7  ;;  %v2272_v5 = vld [vmem:[#allocation5 + $0x100] sm:$0xff]  ;;  %v80_v9 = vld.sshfl [vmem:[#allocation1 + $0x28] sm:$0xff pattern:$0x73625140] }
  0x1d   :  { %508 = vmatpush.bf16.msra.mxu2 %v2258_v23  ;;  %v2280_v6 = vld [vmem:[#allocation5 + $0x140] sm:$0xff]  ;;  %v92_v12 = vpack.c.bf16 %v80_v9, %v80_v9 }
  0x1e   :  { %521 = vmatpush.bf16.msra.mxu3 %v2266_v24  ;;  %v680_v7 = vld [vmem:[%s2988_s4 + $0x4] sm:$0x1]  ;;  %v555_v22 = vld [vmem:[%s2987_s3] sm:$0x1] }
  0x1f   :  { %483 = vmatpush.bf16.msra.mxu0 %v2241_v25  ;;  %v79_v8 = vld.sshfl [vmem:[#allocation1 + $0x20] sm:$0xff pattern:$0x73625140]  ;;  %v682_v10 = vrot.slane %v680_v7, 7 }
  0x20   :  { %496 = vmatpush.bf16.msra.mxu1 %v2249_v28  ;;  %592 = vrot.lane.b32.xlu1 %v590_v55, %s2452_s23  ;;  %v91_v11 = vpack.c.bf16 %v79_v8, %v79_v8  ;;  %v556_v23 = vld [vmem:[%s2988_s4] sm:$0x1] }
  0x21   :  { %509 = vmatpush.bf16.msra.mxu2 %v2257_v30  ;;  %574 = vrot.lane.b32.xlu0 %v572_v56, %s2455_s18  ;;  %v619_v24 = vld [vmem:[%s2987_s3] sm:$0x1]  ;;  %v557_v25 = vadd.f32 %v556_v23, %v555_v22 }
  0x22   :  { %522 = vmatpush.bf16.msra.mxu3 %v2265_v31  ;;  %676 = vrot.lane.b32.xlu2 %v2326_v57, %s2454_s17  ;;  %v620_v26 = vld [vmem:[%s2988_s4] sm:$0x1] }
  0x23   :  { %484 = vmatpush.bf16.msra.mxu0 %v2240_v32  ;;  %v621_v29 = vadd.f32 %v620_v26, %v619_v24  ;;  %559 = vst.msk [vmem:[#allocation2] sm:$0x1] %vm558_vm0, %v557_v25  ;;  %v560_v45 = vld [vmem:[%s2986_s2] sm:$0x1] }
  0x24   :  { %497 = vmatpush.bf16.msra.mxu1 %v2248_v33 }
  0x25   :  { %510 = vmatpush.bf16.msra.mxu2 %v2256_v38  ;;  %622 = vst.msk [vmem:[#allocation2 + $0x5] sm:$0x1] %vm558_vm0, %v621_v29 }
  0x26   :  { %523 = vmatpush.bf16.msra.mxu3 %v2264_v39  ;;  %485 = vmatmul.bf16.vlgmr.msra.gmra.mxu0 %v87_v40  ;;  %v628_v39 = vld [vmem:[%s2988_s4 + $0x1] sm:$0x1] }
  0x27   :  { %529 = vmatpush.bf16.msrb.mxu0 %v2279_v36  ;;  %498 = vmatmul.bf16.vlgmr.msra.gmra.mxu1 %v88_v41  ;;  %v2327_v41 = vld [vmem:[%s2986_s2] ss:$0 sm:$0xff]  ;;  %s2461_s2 = smov [#allocation8]  }
  0x28   :  { %542 = vmatpush.bf16.msrb.mxu1 %v2287_v37  ;;  %511 = vmatmul.bf16.vlgmr.msra.gmra.mxu2 %v89_v48  ;;  %v562_v48 = vld [vmem:[%s2988_s4 + $0x1] sm:$0x1] }
  0x29   :  { %524 = vmatmul.bf16.vlgmr.msra.gmra.mxu3 %v90_v49  ;;  %664 = vrot.lane.b32.xlu1 %v663_v62, %s2452_s23 }
  0x2a   :  { %645 = vrot.lane.b32.xlu0 %v644_v63, %s2455_s18  ;;  %610 = vrot.lane.b32.xlu2 %v608_v2, %s2454_s17 }
  0x2b   :  { %530 = vmatpush.bf16.msrb.mxu0 %v2278_v46  ;;  %v630_v46 = vrot.slane %v628_v39, 7 }
  0x2c   :  { %543 = vmatpush.bf16.msrb.mxu1 %v2286_v47 }
  0x2f   :  { %531 = vmatpush.bf16.msrb.mxu0 %v2277_v51 }
  0x30   :  { %544 = vmatpush.bf16.msrb.mxu1 %v2285_v52 }
  0x32   :  { %683 = vrot.lane.b32.xlu2 %v682_v10, %s2454_s17 }
  0x33   :  { %532 = vmatpush.bf16.msrb.mxu0 %v2276_v53 }
  0x34   :  { %545 = vmatpush.bf16.msrb.mxu1 %v2284_v54 }
  0x37   :  { %533 = vmatpush.bf16.msrb.mxu0 %v2275_v58 }
  0x38   :  { %546 = vmatpush.bf16.msrb.mxu1 %v2283_v59 }
  0x3b   :  { %534 = vmatpush.bf16.msrb.mxu0 %v2274_v0 }
  0x3c   :  { %547 = vmatpush.bf16.msrb.mxu1 %v2282_v1 }
  0x3f   :  { %535 = vmatpush.bf16.msrb.mxu0 %v2273_v3 }
  0x40   :  { %548 = vmatpush.bf16.msrb.mxu1 %v2281_v4 }
  0x43   :  { %536 = vmatpush.bf16.msrb.mxu0 %v2272_v5 }
  0x44   :  { %549 = vmatpush.bf16.msrb.mxu1 %v2280_v6 }
  0x46   :  { %537 = vmatmul.bf16.vlgmr.msrb.gmra.mxu0 %v91_v11 }
  0x47   :  { %550 = vmatmul.bf16.vlgmr.msrb.gmra.mxu1 %v92_v12 }
  0x74   :  { %v658_v19 = vpop.permute.xlu2 %657 }
  0x7c   :  { %v677_v31 = vpop.permute.xlu2 %676 }
  0x82   :  { %v605_v20 = vpop.permute.xlu1 %604 }
  0x83   :  { %v569_v21 = vpop.permute.xlu0 %568 }
  0x84   :  { %v611_v40 = vpop.permute.xlu2 %610 }
  0x8a   :  { %v639_v32 = vpop.permute.xlu1 %638 }
  0x8b   :  { %v587_v33 = vpop.permute.xlu0 %586 }
  0x8c   :  { %v684_v61 = vpop.permute.xlu2 %683 }
  0x92   :  { %v593_v42 = vpop.permute.xlu1 %592 }
  0x93   :  { %v575_v43 = vpop.permute.xlu0 %574 }
  0x9b   :  { %v665_v0 = vpop.permute.xlu1 %664 }
  0x9c   :  { %v646_v1 = vpop.permute.xlu0 %645 }
  0xa3   :  { %v486_v13 = vpop.f32.mrf.mxu0 }
  0xa4   :  { %v499_v14 = vpop.f32.mrf.mxu1 }
  0xa5   :  { %v500_v30 = vadd.f32 %v499_v14, %v486_v13 }
  0xab   :  { %v488_v15 = vpop.f32.mrf.mxu0  ;;  %v512_v17 = vpop.f32.mrf.mxu2 }
  0xac   :  { %v501_v16 = vpop.f32.mrf.mxu1  ;;  %v525_v18 = vpop.f32.mrf.mxu3  ;;  %v513_v34 = vadd.f32 %v512_v17, %v500_v30  ;;  %v2456_v15 = vmov 32.0  }
  0xad   :  { %2337 = vrcp.f32 %v2456_v15  ;;  %v692_v15 = vlaneseq }
  0xae   :  { %v526_v35 = vadd.f32 %v525_v18, %v513_v34 }
  0xb3   :  { %v514_v27 = vpop.f32.mrf.mxu2  ;;  %v2338_v16 = vpop.eup %2337 }
  0xb4   :  { %v527_v28 = vpop.f32.mrf.mxu3  ;;  %v789_v17 = vmul.f32 32.0, %v2338_v16  ;;  %vm793_vm4 = vweird.f32 %v2338_v16 }
  0xb6   :  { %v790_v18 = vsub.f32 1.0, %v789_v17  ;;  %v697_v17 = vand.u32 127, %v692_v15 }
  0xc3   :  { %v538_v36 = vpop.f32.mrf.mxu0 }
  0xc4   :  { %v551_v37 = vpop.f32.mrf.mxu1  ;;  %v539_v38 = vadd.f32 %v538_v36, %v526_v35 }
  0xc6   :  { %v552_v44 = vadd.f32 %v551_v37, %v539_v38 }
  0xc8   :  { %v607_v47 = vadd.f32 %v605_v20, %v552_v44  ;;  %v589_v49 = vadd.f32 %v587_v33, %v552_v44  ;;  %v571_v50 = vadd.f32 %v569_v21, %v552_v44  ;;  %v561_v51 = vadd.f32 %v560_v45, %v552_v44  ;;  %v2288_v33 = vld [vmem:[%s2989_s5] sm:$0xff] }
  0xc9   :  { %v627_v52 = vadd.f32 %v2327_v41, %v552_v44  ;;  %v679_v60 = vadd.f32 %v677_v31, %v552_v44  ;;  %v660_v62 = vadd.f32 %v658_v19, %v552_v44  ;;  %v641_v63 = vadd.f32 %v639_v32, %v552_v44  ;;  %v2289_v32 = vld [vmem:[%s2989_s5 + $0x8] sm:$0xff] }
  0xca   :  { %v613_v53 = vadd.f32 %v611_v40, %v607_v47  ;;  %v595_v56 = vadd.f32 %v593_v42, %v589_v49  ;;  %v577_v57 = vadd.f32 %v575_v43, %v571_v50  ;;  %v563_v58 = vadd.f32 %v562_v48, %v561_v51  ;;  %863 = vmatpush.bf16.msrb.mxu2 %v2289_v32 }
  0xcb   :  { %v540_v54 = vpop.f32.mrf.mxu0  ;;  %v632_v59 = vadd.f32 %v630_v46, %v627_v52  ;;  %v686_v2 = vadd.f32 %v684_v61, %v679_v60  ;;  %v667_v3 = vadd.f32 %v665_v0, %v660_v62  ;;  %v648_v4 = vadd.f32 %v646_v1, %v641_v63 }
  0xcc   :  { %v553_v55 = vpop.f32.mrf.mxu1  ;;  %615 = vrot.lane.b32.xlu2 %v613_v53, %s2455_s18  ;;  %597 = vrot.lane.b32.xlu1 %v595_v56, %s2452_s23  ;;  %564 = vst.msk [vmem:[#allocation2 + $0x1] sm:$0x1] %vm558_vm0, %v563_v58  ;;  %v791_v19 = vmul.f32 %v2338_v16, %v790_v18 }
  0xcd   :  { %579 = vrot.lane.b32.xlu0 %v577_v57, %s2454_s17  ;;  %634 = vst.msk [vmem:[#allocation2 + $0x5] sm:$0x2] %vm633_vm1, %v632_v59  ;;  %v2328_v57 = vld [vmem:[%s2990_s6] ss:$0 sm:$0xff] }
  0xce   :  { %v792_v20 = vadd.f32 %v2338_v16, %v791_v19  ;;  %864 = vmatpush.bf16.msrb.mxu2 %v2288_v33 }
  0xd0   :  { %v2649_v21 = vsel %vm793_vm4, %v2338_v16, %v792_v20  ;;  %v693_v16 = vshrl.u32 %v692_v15, 7  ;;  %vm724_vm4 = vcmp.ge.s32.totalorder %v697_v17, 5 }
  0xd2   :  { %v694_v18 = vadd.s32 8, %v693_v16 }
  0xd4   :  { %688 = vrot.lane.b32.xlu2 %v686_v2, %s2455_s18  ;;  %669 = vrot.lane.b32.xlu1 %v667_v3, %s2452_s23 }
  0xd5   :  { %650 = vrot.lane.b32.xlu0 %v648_v4, %s2454_s17 }
 0x126   :  { %v616_v5 = vpop.permute.xlu2 %615 }
 0x127   :  { %618 = vst.msk [vmem:[#allocation2 + $0x4] sm:$0x1] %vm558_vm0, %v616_v5 }
 0x12e   :  { %v689_v6 = vpop.permute.xlu2 %688 }
 0x12f   :  { %691 = vst.msk [vmem:[#allocation2 + $0x8] sm:$0x2] %vm633_vm1, %v689_v6 }
 0x13e   :  { %v598_v7 = vpop.permute.xlu1 %597 }
 0x13f   :  { %v580_v8 = vpop.permute.xlu0 %579  ;;  %600 = vst.msk [vmem:[#allocation2 + $0x3] sm:$0x1] %vm558_vm0, %v598_v7 }
 0x140   :  { %582 = vst.msk [vmem:[#allocation2 + $0x2] sm:$0x1] %vm558_vm0, %v580_v8  ;;  %vm3000_vm0 = vcmask 386304  }
 0x146   :  { %v670_v9 = vpop.permute.xlu1 %669 }
 0x147   :  { %v651_v10 = vpop.permute.xlu0 %650  ;;  %672 = vst.msk [vmem:[#allocation2 + $0x7] sm:$0x2] %vm633_vm1, %v670_v9 }
 0x148   :  { %653 = vst.msk [vmem:[#allocation2 + $0x6] sm:$0x2] %vm633_vm1, %v651_v10  ;;  %vm715_vm1 = vcmp.ge.s32.totalorder %v693_v16, 5 }
 0x14e   :  { %v2641_v11 = vld [vmem:[#allocation2 + $0x8] sm:$0x3] }
 0x14f   :  { %v785_v12 = vsel %vm3004_vm2, %v2641_v11, 0.0  ;;  %v2645_v13 = vld [vmem:[#allocation2] sm:$0xff] }
 0x150   :  { %786 = vadd.xlane.f32.xlu1 %v785_v12  ;;  %v781_v14 = vsel %vm3005_vm3, %v2645_v13, 0.0 }
 0x151   :  { %782 = vadd.xlane.f32.xlu0 %v781_v14 }
 0x1c3   :  { %v787_v22 = vpop.xlane.xlu1 %786 }
 0x1c4   :  { %v783_v23 = vpop.xlane.xlu0 %782  ;;  %v796_v25 = vmul.f32 %v2649_v21, %v787_v22 }
 0x1c5   :  { %v795_v24 = vmul.f32 %v2649_v21, %v783_v23  ;;  %v2459_v23 = vmov -1e+30  }
 0x1c6   :  { %v798_v28 = vsub.f32 %v2641_v11, %v796_v25 }
 0x1c7   :  { %v797_v26 = vsub.f32 %v2645_v13, %v795_v24 }
 0x1c8   :  { %v800_v30 = vmul.f32 %v798_v28, %v798_v28 }
 0x1c9   :  { %v799_v27 = vmul.f32 %v797_v26, %v797_v26 }
 0x1ca   :  { %v804_v31 = vsel %vm3004_vm2, %v800_v30, 0.0 }
 0x1cb   :  { %v801_v29 = vsel %vm3005_vm3, %v799_v27, 0.0  ;;  %v695_v27 = vadd.s32 16, %v693_v16 }
 0x1cc   :  { %802 = vadd.xlane.f32.xlu2 %v801_v29 }
 0x1d4   :  { %805 = vadd.xlane.f32.xlu2 %v804_v31 }
 0x23f   :  { %v803_v34 = vpop.xlane.xlu2 %802 }
 0x240   :  { %v807_v35 = vmul.f32 %v803_v34, %v2649_v21 }
 0x242   :  { %v809_v36 = vadd.f32 1e-06, %v807_v35 }
 0x244   :  { %2339 = vrsqrt.f32 %v809_v36  ;;  %vm817_vm6 = vweird.f32 %v809_v36 }
 0x247   :  { %v806_v37 = vpop.xlane.xlu2 %805 }
 0x248   :  { %v808_v38 = vmul.f32 %v806_v37, %v2649_v21 }
 0x24a   :  { %v2340_v39 = vpop.eup %2339  ;;  %v810_v40 = vadd.f32 1e-06, %v808_v38 }
 0x24b   :  { %v812_v41 = vmul.f32 %v2340_v39, %v809_v36  ;;  %vm818_vm5 = vweird.f32 %v2340_v39 }
 0x24c   :  { %2341 = vrsqrt.f32 %v810_v40  ;;  %vm819_vm8 = vmor %vm817_vm6, %vm818_vm5  ;;  %vm827_vm9 = vweird.f32 %v810_v40  ;;  %vm701_vm5 = vcmp.lt.s32.totalorder %v693_v16, 5  ;;  %vm711_vm6 = vcmp.lt.s32.totalorder %v697_v17, 5 }
 0x24d   :  { %v813_v42 = vmul.f32 %v2340_v39, %v812_v41 }
 0x24f   :  { %v814_v43 = vmul.f32 0.5, %v813_v42 }
 0x251   :  { %v815_v45 = vsub.f32 1.5, %v814_v43 }
 0x252   :  { %v2342_v44 = vpop.eup %2341 }
 0x253   :  { %v822_v46 = vmul.f32 %v2342_v44, %v810_v40  ;;  %v816_v48 = vmul.f32 %v2340_v39, %v815_v45  ;;  %vm828_vm7 = vweird.f32 %v2342_v44 }
 0x254   :  { %vm829_vm10 = vmor %vm827_vm9, %vm828_vm7  ;;  %vm736_vm7 = vcmp.ge.s32.totalorder %v694_v18, 10 }
 0x255   :  { %v823_v47 = vmul.f32 %v2342_v44, %v822_v46  ;;  %v820_v51 = vsel %vm819_vm8, %v2340_v39, %v816_v48  ;;  %vm739_vm8 = vcmp.lt.s32.totalorder %v694_v18, 15  ;;  %vm725_vm9 = vmand %vm715_vm1, %vm724_vm4 }
 0x256   :  { %v831_v54 = vmul.f32 %v820_v51, %v797_v26 }
 0x257   :  { %v824_v49 = vmul.f32 0.5, %v823_v47 }
 0x259   :  { %v825_v50 = vsub.f32 1.5, %v824_v49 }
 0x25b   :  { %v826_v52 = vmul.f32 %v2342_v44, %v825_v50 }
 0x25d   :  { %v830_v53 = vsel %vm829_vm10, %v2342_v44, %v826_v52  ;;  %vm728_vm10 = vcmp.lt.s32.totalorder %v697_v17, 10 }
 0x25e   :  { %v832_v55 = vmul.f32 %v830_v53, %v798_v28  ;;  %vm729_vm2 = vmand %vm725_vm9, %vm728_vm10 }
 0x260   :  { %v833_v56 = vpack.c.bf16 %v832_v55, %v831_v54 }
 0x262   :  { %2119 = vmatmul.msk.bf16.vlgmr.msrb.gmra.mxu2 %vm3005_vm3, %v833_v56 }
 0x2e5   :  { %v866_v58 = vpop.f32.mrf.mxu2 }
 0x2e6   :  { %v867_v59 = vadd.f32 %v2328_v57, %v866_v58 }
 0x2e8   :  { %887 = vrot.lane.b32.xlu2 %v867_v59, %s2454_s17  ;;  %877 = vrot.lane.b32.xlu0 %v867_v59, %s2457_s27  ;;  %872 = vst.msk [vmem:[#allocation3] sm:$0xff] %vm3007_vm11, %v867_v59 }
 0x2ed   :  { %v868_v60 = vpop.f32.mrf.mxu2 }
 0x2ee   :  { %v869_v61 = vadd.f32 %v2328_v57, %v868_v60 }
 0x2f0   :  { %879 = vrot.lane.b32.xlu1 %v869_v61, %s2457_s27  ;;  %889 = vrot.lane.b32.xlu0 %v869_v61, %s2454_s17  ;;  %874 = vst.msk [vmem:[#allocation3 + $0x8] sm:$0x3] %vm3006_vm12, %v869_v61 }
 0x2f8   :  { %901 = vrot.lane.b32.xlu1 %v867_v59, %s2458_s28  ;;  %903 = vrot.lane.b32.xlu0 %v869_v61, %s2458_s28 }
 0x342   :  { %v888_v63 = vpop.permute.xlu2 %887 }
 0x35a   :  { %v878_v62 = vpop.permute.xlu0 %877 }
 0x35b   :  { %884 = vst.msk [vmem:[#allocation3] sm:$0xff] %vm3002_vm13, %v878_v62 }
 0x35c   :  { %894 = vst.msk [vmem:[#allocation3] sm:$0xff] %vm3001_vm14, %v888_v63 }
 0x35d   :  { %897 = vst.msk [vmem:[#allocation3 + $0xa] sm:$0xff] %vm3007_vm11, %v878_v62 }
 0x35e   :  { %899 = vst.msk [vmem:[#allocation3 + $0xa] sm:$0xff] %vm3002_vm13, %v888_v63  ;;  %vm742_vm13 = vmand %vm736_vm7, %vm739_vm8 }
 0x362   :  { %v880_v0 = vpop.permute.xlu1 %879  ;;  %v890_v1 = vpop.permute.xlu0 %889 }
 0x363   :  { %886 = vst.msk [vmem:[#allocation3 + $0x8] sm:$0x3] %vm3003_vm15, %v880_v0  ;;  %v909_v4 = vld [vmem:[#allocation3] sm:$0xff] }
 0x364   :  { %898 = vst.msk [vmem:[#allocation3 + $0x12] sm:$0x3] %vm3006_vm12, %v880_v0 }
 0x365   :  { %896 = vst.msk [vmem:[#allocation3 + $0x8] sm:$0x3] %vm3000_vm0, %v890_v1 }
 0x366   :  { %900 = vst.msk [vmem:[#allocation3 + $0x12] sm:$0x3] %vm3003_vm15, %v890_v1  ;;  %vm744_vm15 = vcmp.ge.s32.totalorder %v697_v17, 10 }
 0x367   :  { %vm746_vm12 = vmand %vm742_vm13, %vm744_vm15 }
 0x36a   :  { %v902_v2 = vpop.permute.xlu1 %901  ;;  %v904_v3 = vpop.permute.xlu0 %903 }
 0x36b   :  { %907 = vst.msk [vmem:[#allocation3 + $0xa] sm:$0xff] %vm3001_vm14, %v902_v2  ;;  %vm719_vm14 = vcmp.lt.s32.totalorder %v694_v18, 10 }
 0x36c   :  { %908 = vst.msk [vmem:[#allocation3 + $0x12] sm:$0x3] %vm3000_vm0, %v904_v3  ;;  %vm2701_vm0 = vmand %vm701_vm5, %vm711_vm6  ;;  %vm756_vm5 = vcmp.ge.s32.totalorder %v694_v18, 15  ;;  %vm764_vm6 = vcmp.ge.s32.totalorder %v697_v17, 15  ;;  %v2329_v18 = vld [vmem:[%s2992_s8] ss:$0 sm:$0xff] }
 0x36d   :  { %vm726_vm3 = vmand %vm719_vm14, %vm724_vm4  ;;  %vm768_vm4 = vcmp.lt.s32.totalorder %v697_v17, 20  ;;  %vm956_vm14 = vcmask 162816  }
 0x36e   :  { %vm732_vm1 = vmor %vm2701_vm0, %vm729_vm2  ;;  %vm963_vm0 = vcmask 158720  }
 0x36f   :  { %vm2707_vm7 = vmand %vm726_vm3, %vm728_vm10  ;;  %v2712_v24 = vsel %vm732_vm1, 0.0, %v2459_v23  ;;  %vm1004_vm10 = vcmask 1041408   ;;  %vm3012_vm1 = vcmask 130048  }
 0x370   :  { %vm766_vm9 = vmand %vm756_vm5, %vm764_vm6  ;;  %vm3013_vm5 = vcmask 123904  }
 0x371   :  { %vm770_vm2 = vmand %vm766_vm9, %vm768_vm4 }
 0x372   :  { %v910_v5 = vld [vmem:[#allocation3 + $0x8] sm:$0xff] }
 0x373   :  { %v911_v6 = vld [vmem:[#allocation3 + $0x10] sm:$0xf]  ;;  %v2687_v7 = vpack.c.bf16 %v910_v5, %v909_v4 }
 0x374   :  { %v2689_v8 = vpack.c.bf16 %v911_v6, %v911_v6 }
 0x375   :  { %916 = vrot.lane.b32.xlu1 %v2687_v7, %s2457_s27 }
 0x376   :  { %918 = vrot.lane.b32.xlu2 %v2689_v8, %s2457_s27 }
 0x3d0   :  { %v919_v9 = vpop.permute.xlu2 %918 }
 0x3d1   :  { %v930_v10 = vsel %vm3007_vm11, %v919_v9, 0  ;;  %v2291_v9 = vld [vmem:[%s2991_s7 + $0x8] sm:$0xff] }
 0x3d2   :  { %938 = vmatpush.bf16.xpose.msrb.mxu3 %v930_v10  ;;  %1072 = vmatpush.bf16.msra.mxu0 %v2291_v9 }
 0x3e7   :  { %v917_v12 = vpop.permute.xlu1 %916 }
 0x3e8   :  { %v927_v14 = vsel %vm3007_vm11, %v917_v12, 0  ;;  %v2290_v12 = vld [vmem:[%s2991_s7] sm:$0xff] }
 0x3e9   :  { %939 = vmatpush.bf16.xpose.msrb.mxu3 %v927_v14  ;;  %1073 = vmatpush.bf16.msra.mxu0 %v2290_v12 }
 0x3f0   :  { %2120 = vmatmul.msk.bf16.vlgmr.msrb.gmra.mxu3 %vm3007_vm11, %v2687_v7 }
 0x400   :  { %2121 = vmatmul.msk.bf16.gmra.mxu3 %vm3007_vm11, %v2689_v8  ;;  %vm748_vm11 = vcmp.lt.s32.totalorder %v697_v17, 15 }
 0x401   :  { %vm750_vm8 = vmand %vm746_vm12, %vm748_vm11  ;;  %vm760_vm11 = vcmp.lt.s32.totalorder %v695_v27, 20 }
 0x402   :  { %vm753_vm13 = vmor %vm2707_vm7, %vm750_vm8  ;;  %vm1038_vm7 = vcmask 257152   ;;  %vm3014_vm8 = vcmask 261120  }
 0x403   :  { %vm773_vm3 = vmor %vm753_vm13, %vm770_vm2 }
 0x404   :  { %v2719_v30 = vsel %vm773_vm3, 0.0, %v2459_v23  ;;  %vm767_vm12 = vmand %vm760_vm11, %vm764_vm6  ;;  %vm1036_vm6 = vcmask 261250  }
 0x405   :  { %vm771_vm15 = vmand %vm767_vm12, %vm768_vm4  ;;  %vm3016_vm4 = vcmask 254976  }
 0x406   :  { %v2725_v35 = vsel %vm771_vm15, 0.0, %v2459_v23  ;;  %vm3015_vm9 = vmmov %vm3014_vm8 }
 0x407   :  { %vm3017_vm13 = vmmov %vm3014_vm8 }
 0x408   :  { %vm3018_vm2 = vmmov %vm3016_vm4 }
 0x473   :  { %v941_v22 = vpop.f32.mrf.mxu3 }
 0x474   :  { %v950_v25 = vmul.f32 0.25, %v941_v22 }
 0x476   :  { %v953_v26 = vadd.f32 %v950_v25, %v2712_v24 }
 0x478   :  { %v957_v28 = vsel %vm956_vm14, %v953_v26, -inf }
 0x479   :  { %958 = vmax.xlane.f32.xlu0 %v957_v28 }
 0x47b   :  { %v943_v29 = vpop.f32.mrf.mxu3 }
 0x47c   :  { %v951_v31 = vmul.f32 0.25, %v943_v29 }
 0x47e   :  { %v954_v32 = vadd.f32 %v951_v31, %v2719_v30 }
 0x480   :  { %v960_v33 = vsel %vm956_vm14, %v954_v32, -inf }
 0x481   :  { %961 = vmax.xlane.f32.xlu2 %v960_v33 }
 0x483   :  { %v946_v34 = vpop.f32.mrf.mxu3 }
 0x484   :  { %v952_v36 = vmul.f32 0.25, %v946_v34 }
 0x486   :  { %v955_v37 = vadd.f32 %v952_v36, %v2725_v35 }
 0x488   :  { %v964_v38 = vsel %vm963_vm0, %v955_v37, -inf }
 0x489   :  { %965 = vmax.xlane.f32.xlu1 %v964_v38 }
 0x48b   :  { %v948_v39 = vpop.f32.mrf.mxu3 }
 0x48c   :  { %v2293_v39 = vld [vmem:[%s2993_s9 + $0x8] sm:$0xff] }
 0x48d   :  { %1156 = vmatpush.bf16.msra.mxu1 %v2293_v39 }
 0x4a2   :  { %995 = vrot.lane.b32.xlu1 %v2689_v8, %s2454_s17 }
 0x4ec   :  { %v959_v40 = vpop.xlane.xlu0 %958 }
 0x4ed   :  { %v967_v41 = vsub.f32 %v953_v26, %v959_v40 }
 0x4ef   :  { %v970_v42 = vmul.f32 1.442695, %v967_v41  ;;  %v2292_v41 = vld [vmem:[%s2993_s9] sm:$0xff] }
 0x4f0   :  { %1157 = vmatpush.bf16.msra.mxu1 %v2292_v41 }
 0x4f1   :  { %2343 = vpow2.f32 %v970_v42 }
 0x4f4   :  { %v962_v43 = vpop.xlane.xlu2 %961 }
 0x4f5   :  { %v968_v44 = vsub.f32 %v954_v32, %v962_v43 }
 0x4f7   :  { %v2344_v45 = vpop.eup %2343  ;;  %v972_v46 = vmul.f32 1.442695, %v968_v44 }
 0x4f8   :  { %v976_v47 = vsel %vm956_vm14, %v2344_v45, 0.0 }
 0x4f9   :  { %2345 = vpow2.f32 %v972_v46  ;;  %977 = vadd.xlane.f32.xlu0 %v976_v47 }
 0x4fc   :  { %v966_v48 = vpop.xlane.xlu1 %965 }
 0x4fd   :  { %v969_v49 = vsub.f32 %v955_v37, %v966_v48 }
 0x4ff   :  { %v2346_v50 = vpop.eup %2345  ;;  %v974_v51 = vmul.f32 1.442695, %v969_v49 }
 0x500   :  { %v979_v52 = vsel %vm956_vm14, %v2346_v50, 0.0 }
 0x501   :  { %2347 = vpow2.f32 %v974_v51  ;;  %980 = vadd.xlane.f32.xlu2 %v979_v52 }
 0x507   :  { %v2348_v53 = vpop.eup %2347 }
 0x508   :  { %v982_v54 = vsel %vm963_vm0, %v2348_v53, 0.0 }
 0x509   :  { %983 = vadd.xlane.f32.xlu2 %v982_v54 }
 0x50d   :  { %993 = vrot.lane.b32.xlu0 %v2687_v7, %s2454_s17 }
 0x514   :  { %v996_v55 = vpop.permute.xlu1 %995 }
 0x515   :  { %v1006_v56 = vsel %vm1004_vm10, %v996_v55, 0 }
 0x516   :  { %1014 = vmatpush.bf16.msra.mxu2 %v1006_v56 }
 0x56c   :  { %v978_v57 = vpop.xlane.xlu0 %977 }
 0x574   :  { %v981_v58 = vpop.xlane.xlu2 %980 }
 0x575   :  { %2349 = vrcp.f32 %v981_v58 }
 0x576   :  { %2351 = vrcp.f32 %v978_v57 }
 0x57b   :  { %v2350_v59 = vpop.eup %2349 }
 0x57c   :  { %v2352_v60 = vpop.eup %2351  ;;  %v989_v61 = vmul.f32 %v2350_v59, %v2346_v50  ;;  %v984_v1 = vpop.xlane.xlu2 %983 }
 0x57d   :  { %v988_v62 = vmul.f32 %v2352_v60, %v2344_v45  ;;  %2353 = vrcp.f32 %v984_v1 }
 0x57f   :  { %v994_v63 = vpop.permute.xlu0 %993  ;;  %v991_v0 = vpack.c.bf16 %v989_v61, %v988_v62 }
 0x580   :  { %1015 = vmatpush.bf16.msra.mxu2 %v994_v63 }
 0x583   :  { %2122 = vmatmul.msk.bf16.vlgmr.msra.gmra.mxu2 %vm956_vm14, %v991_v0  ;;  %v2354_v2 = vpop.eup %2353  ;;  %v2330_v0 = vld [vmem:[%s2994_s10] ss:$0 sm:$0xff] }
 0x584   :  { %v990_v3 = vmul.f32 %v2354_v2, %v2348_v53 }
 0x586   :  { %v992_v4 = vpack.c.bf16 %v990_v3, %v990_v3 }
 0x593   :  { %2123 = vmatmul.msk.bf16.gmra.mxu2 %vm956_vm14, %v992_v4 }
 0x606   :  { %v1017_v5 = vpop.f32.mrf.mxu2 }
 0x607   :  { %1026 = vst.msk [vmem:[#allocation4] sm:$0xff] %vm3012_vm1, %v1017_v5 }
 0x60e   :  { %v1019_v6 = vpop.f32.mrf.mxu2 }
 0x60f   :  { %1027 = vst.msk [vmem:[#allocation4 + $0x8] sm:$0x3] %vm3013_vm5, %v1019_v6  ;;  %1030 = vrot.lane.b32.xlu2 %v1019_v6, %s2460_s29 }
 0x616   :  { %v1022_v7 = vpop.f32.mrf.mxu2 }
 0x617   :  { %1032 = vrot.lane.b32.xlu0 %v1022_v7, %s2460_s29 }
 0x61e   :  { %v1024_v8 = vpop.f32.mrf.mxu2 }
 0x669   :  { %v1031_v10 = vpop.permute.xlu2 %1030 }
 0x66a   :  { %1037 = vst.msk [vmem:[#allocation4 - $0x2] sm:$0xfc] %vm1036_vm6, %v1031_v10 }
 0x689   :  { %v1033_v14 = vpop.permute.xlu0 %1032 }
 0x68a   :  { %1039 = vst.msk [vmem:[#allocation4 + $0x6] sm:$0xf] %vm1038_vm7, %v1033_v14 }
 0x691   :  { %v1040_v15 = vld [vmem:[#allocation4] sm:$0xff]  ;;  %v1041_v16 = vld [vmem:[#allocation4 + $0x8] sm:$0x3] }
 0x692   :  { %v1042_v17 = vpack.c.bf16 %v1041_v16, %v1040_v15 }
 0x694   :  { %2132 = vmatmul.msk.bf16.vlgmr.msra.gmra.mxu0 %vm3014_vm8, %v1042_v17 }
 0x711   :  { %v1075_v19 = vpop.f32.mrf.mxu0 }
 0x712   :  { %v1076_v20 = vadd.f32 %v2329_v18, %v1075_v19 }
 0x714   :  { %v2756_v22 = vadd.f32 %v1076_v20, %v2645_v13 }
 0x716   :  { %v1082_v23 = vsel %vm3015_vm9, %v2756_v22, 0.0 }
 0x717   :  { %1083 = vadd.xlane.f32.xlu1 %v1082_v23 }
 0x719   :  { %v1077_v25 = vpop.f32.mrf.mxu0 }
 0x71a   :  { %v1078_v26 = vadd.f32 %v2329_v18, %v1077_v25  ;;  %v2297_v18 = vld [vmem:[%s2995_s11 + $0x18] sm:$0xff] }
 0x71b   :  { %1289 = vmatpush.bf16.msra.mxu3 %v2297_v18 }
 0x71c   :  { %v2761_v27 = vadd.f32 %v1078_v26, %v2641_v11  ;;  %v2296_v26 = vld [vmem:[%s2995_s11 + $0x10] sm:$0xff] }
 0x71e   :  { %v1085_v28 = vsel %vm3016_vm4, %v2761_v27, 0.0 }
 0x71f   :  { %1086 = vadd.xlane.f32.xlu0 %v1085_v28  ;;  %1290 = vmatpush.bf16.msra.mxu3 %v2296_v26 }
 0x78a   :  { %v1084_v29 = vpop.xlane.xlu1 %1083 }
 0x78b   :  { %v1088_v31 = vmul.f32 %v1084_v29, %v2649_v21 }
 0x78d   :  { %v1090_v32 = vsub.f32 %v2756_v22, %v1088_v31 }
 0x78f   :  { %v1092_v13 = vmul.f32 %v1090_v32, %v1090_v32 }
 0x791   :  { %v1094_v33 = vsel %vm3017_vm13, %v1092_v13, 0.0 }
 0x792   :  { %v1087_v34 = vpop.xlane.xlu0 %1086  ;;  %1095 = vadd.xlane.f32.xlu2 %v1094_v33 }
 0x793   :  { %v1089_v36 = vmul.f32 %v1087_v34, %v2649_v21 }
 0x795   :  { %v1091_v37 = vsub.f32 %v2761_v27, %v1089_v36  ;;  %v2295_v36 = vld [vmem:[%s2995_s11 + $0x8] sm:$0xff] }
 0x796   :  { %1291 = vmatpush.bf16.msra.mxu3 %v2295_v36 }
 0x797   :  { %v1093_v11 = vmul.f32 %v1091_v37, %v1091_v37 }
 0x799   :  { %v1097_v38 = vsel %vm3018_vm2, %v1093_v11, 0.0 }
 0x79a   :  { %1098 = vadd.xlane.f32.xlu1 %v1097_v38 }
 0x805   :  { %v1096_v40 = vpop.xlane.xlu2 %1095 }
 0x806   :  { %v1100_v42 = vmul.f32 %v1096_v40, %v2649_v21 }
 0x808   :  { %v1102_v43 = vadd.f32 1e-06, %v1100_v42 }
 0x80a   :  { %2355 = vrsqrt.f32 %v1102_v43  ;;  %vm1110_vm11 = vweird.f32 %v1102_v43 }
 0x80d   :  { %v1099_v44 = vpop.xlane.xlu1 %1098 }
 0x80e   :  { %v1101_v45 = vmul.f32 %v1099_v44, %v2649_v21 }
 0x810   :  { %v2356_v46 = vpop.eup %2355  ;;  %v1103_v47 = vadd.f32 1e-06, %v1101_v45 }
 0x811   :  { %v1105_v48 = vmul.f32 %v2356_v46, %v1102_v43  ;;  %vm1111_vm3 = vweird.f32 %v2356_v46  ;;  %v2294_v43 = vld [vmem:[%s2995_s11] sm:$0xff] }
 0x812   :  { %2357 = vrsqrt.f32 %v1103_v47  ;;  %vm1112_vm15 = vmor %vm1110_vm11, %vm1111_vm3  ;;  %vm1120_vm1 = vweird.f32 %v1103_v47  ;;  %1292 = vmatpush.bf16.msra.mxu3 %v2294_v43 }
 0x813   :  { %v1106_v49 = vmul.f32 %v2356_v46, %v1105_v48 }
 0x815   :  { %v1107_v50 = vmul.f32 0.5, %v1106_v49 }
 0x817   :  { %v1108_v52 = vsub.f32 1.5, %v1107_v50 }
 0x818   :  { %v2358_v51 = vpop.eup %2357 }
 0x819   :  { %v1115_v53 = vmul.f32 %v2358_v51, %v1103_v47  ;;  %v1109_v55 = vmul.f32 %v2356_v46, %v1108_v52  ;;  %vm1121_vm12 = vweird.f32 %v2358_v51 }
 0x81a   :  { %vm1122_vm5 = vmor %vm1120_vm1, %vm1121_vm12 }
 0x81b   :  { %v1116_v54 = vmul.f32 %v2358_v51, %v1115_v53  ;;  %v1113_v58 = vsel %vm1112_vm15, %v2356_v46, %v1109_v55 }
 0x81c   :  { %v1124_v61 = vmul.f32 %v1113_v58, %v1090_v32 }
 0x81d   :  { %v1117_v56 = vmul.f32 0.5, %v1116_v54 }
 0x81f   :  { %v1118_v57 = vsub.f32 1.5, %v1117_v56 }
 0x821   :  { %v1119_v59 = vmul.f32 %v2358_v51, %v1118_v57 }
 0x823   :  { %v1123_v60 = vsel %vm1122_vm5, %v2358_v51, %v1119_v59 }
 0x824   :  { %v1125_v62 = vmul.f32 %v1123_v60, %v1091_v37 }
 0x826   :  { %v1126_v63 = vpack.c.bf16 %v1125_v62, %v1124_v61 }
 0x828   :  { %2141 = vmatmul.msk.bf16.vlgmr.msra.gmra.mxu1 %vm3014_vm8, %v1126_v63  ;;  %vm1281_vm8 = vcmask 523264  }
 0x8a5   :  { %v1159_v1 = vpop.f32.mrf.mxu1 }
 0x8a6   :  { %v2783_v2 = vadd.f32 %v2330_v0, %v1159_v1 }
 0x8a8   :  { %v2786_v3 = vmul.f32 0.70710677, %v2783_v2 }
 0x8aa   :  { %v1166_v4 = vand.u32 2147483647, %v2786_v3  ;;  %vm1232_vm1 = vcmp.ge.f32.partialorder %v2786_v3, 0.0  ;;  %v2331_v3 = vld [vmem:[%s2996_s12] ss:$0 sm:$0xff] }
 0x8ac   :  { %v1168_v5 = vmul.f32 0.3275911, %v1166_v4  ;;  %v1220_v13 = vsub.f32 0.0, %v1166_v4 }
 0x8ad   :  { %v1161_v6 = vpop.f32.mrf.mxu1 }
 0x8ae   :  { %v1170_v7 = vadd.f32 1.0, %v1168_v5  ;;  %v2789_v8 = vadd.f32 %v2330_v0, %v1161_v6  ;;  %v1222_v39 = vmul.f32 %v1220_v13, %v1166_v4 }
 0x8b0   :  { %2359 = vrcp.f32 %v1170_v7  ;;  %v2792_v9 = vmul.f32 0.70710677, %v2789_v8  ;;  %v1183_v19 = vand.u32 2147483648, %v1170_v7  ;;  %v1181_v23 = vand.u32 2147483647, %v1170_v7 }
 0x8b1   :  { %vm1177_vm4 = vweird.f32 %v1170_v7  ;;  %v1224_v47 = vmul.f32 1.442695, %v1222_v39 }
 0x8b2   :  { %v1167_v10 = vand.u32 2147483647, %v2792_v9  ;;  %v1184_v28 = vor.u32 1.1754944e-38, %v1183_v19  ;;  %vm1182_vm2 = vcmp.eq.f32.partialorder %v1181_v23, 8.507059e+37  ;;  %vm1233_vm5 = vcmp.ge.f32.partialorder %v2792_v9, 0.0 }
 0x8b3   :  { %v1239_v23 = vmul.f32 0.5, %v2789_v8 }
 0x8b4   :  { %v1169_v12 = vmul.f32 0.3275911, %v1167_v10  ;;  %v1221_v51 = vsub.f32 0.0, %v1167_v10 }
 0x8b6   :  { %v2360_v14 = vpop.eup %2359  ;;  %v1171_v16 = vadd.f32 1.0, %v1169_v12  ;;  %v1223_v56 = vmul.f32 %v1221_v51, %v1167_v10 }
 0x8b7   :  { %v1173_v15 = vmul.f32 %v2360_v14, %v1170_v7  ;;  %vm1178_vm9 = vweird.f32 %v2360_v14 }
 0x8b8   :  { %2361 = vrcp.f32 %v1171_v16  ;;  %vm1179_vm13 = vmor %vm1177_vm4, %vm1178_vm9  ;;  %v1198_v38 = vand.u32 2147483648, %v1171_v16  ;;  %v1196_v41 = vand.u32 2147483647, %v1171_v16  ;;  %vm1192_vm11 = vweird.f32 %v1171_v16 }
 0x8b9   :  { %v1174_v17 = vsub.f32 1.0, %v1173_v15  ;;  %2363 = vpow2.f32 %v1224_v47  ;;  %v1226_v61 = vmul.f32 1.442695, %v1223_v56  ;;  %vm3019_vm9 = vcmask 261120  }
 0x8ba   :  { %v1199_v46 = vor.u32 1.1754944e-38, %v1198_v38  ;;  %vm1197_vm15 = vcmp.eq.f32.partialorder %v1196_v41, 8.507059e+37  ;;  %vm3020_vm4 = vcmask 254976  }
 0x8bb   :  { %v1175_v20 = vmul.f32 %v2360_v14, %v1174_v17  ;;  %2365 = vpow2.f32 %v1226_v61 }
 0x8bd   :  { %v1176_v25 = vadd.f32 %v2360_v14, %v1175_v20  ;;  %v1238_v20 = vmul.f32 0.5, %v2783_v2 }
 0x8be   :  { %v2362_v29 = vpop.eup %2361 }
 0x8bf   :  { %v1180_v31 = vsel %vm1179_vm13, %v2360_v14, %v1176_v25  ;;  %v1188_v33 = vmul.f32 %v2362_v29, %v1171_v16  ;;  %vm1193_vm3 = vweird.f32 %v2362_v29  ;;  %v2364_v62 = vpop.eup %2363  ;;  %vm3021_vm13 = vmmov %vm3019_vm9 }
 0x8c0   :  { %v1185_v32 = vsel %vm1182_vm2, %v1184_v28, %v1180_v31  ;;  %vm1194_vm12 = vmor %vm1192_vm11, %vm1193_vm3 }
 0x8c1   :  { %v1202_v34 = vmul.f32 1.0614054, %v1185_v32  ;;  %v1189_v37 = vsub.f32 1.0, %v1188_v33  ;;  %v2366_v14 = vpop.eup %2365  ;;  %vm3022_vm2 = vmmov %vm3020_vm4 }
 0x8c2   :  { %vm3023_vm3 = vmmov %vm3019_vm9 }
 0x8c3   :  { %v1204_v11 = vadd.f32 -1.4531521, %v1202_v34  ;;  %v1190_v40 = vmul.f32 %v2362_v29, %v1189_v37  ;;  %vm3024_vm11 = vmmov %vm3022_vm2 }
 0x8c5   :  { %v1206_v42 = vmul.f32 %v1204_v11, %v1185_v32  ;;  %v1191_v44 = vadd.f32 %v2362_v29, %v1190_v40 }
 0x8c7   :  { %v1208_v45 = vadd.f32 1.4214138, %v1206_v42  ;;  %v1195_v48 = vsel %vm1194_vm12, %v2362_v29, %v1191_v44 }
 0x8c8   :  { %v1200_v50 = vsel %vm1197_vm15, %v1199_v46, %v1195_v48  ;;  %v2298_v46 = vld [vmem:[%s2989_s5 + $0x10] sm:$0xff] }
 0x8c9   :  { %v1210_v49 = vmul.f32 %v1208_v45, %v1185_v32  ;;  %v1203_v52 = vmul.f32 1.0614054, %v1200_v50  ;;  %v2299_v45 = vld [vmem:[%s2989_s5 + $0x18] sm:$0xff] }
 0x8ca   :  { %1381 = vmatpush.bf16.msrb.mxu0 %v2299_v45 }
 0x8cb   :  { %v1212_v53 = vadd.f32 -0.28449672, %v1210_v49  ;;  %v1205_v54 = vadd.f32 -1.4531521, %v1203_v52 }
 0x8cd   :  { %v1214_v55 = vmul.f32 %v1212_v53, %v1185_v32  ;;  %v1207_v57 = vmul.f32 %v1205_v54, %v1200_v50 }
 0x8ce   :  { %1382 = vmatpush.bf16.msrb.mxu0 %v2298_v46 }
 0x8cf   :  { %v1216_v58 = vadd.f32 0.2548296, %v1214_v55  ;;  %v1209_v59 = vadd.f32 1.4214138, %v1207_v57 }
 0x8d1   :  { %v1218_v60 = vmul.f32 %v1216_v58, %v1185_v32  ;;  %v1211_v63 = vmul.f32 %v1209_v59, %v1200_v50 }
 0x8d3   :  { %v1228_v0 = vmul.f32 %v2364_v62, %v1218_v60  ;;  %v1213_v1 = vadd.f32 -0.28449672, %v1211_v63 }
 0x8d5   :  { %v1230_v4 = vsub.f32 1.0, %v1228_v0  ;;  %v1215_v5 = vmul.f32 %v1213_v1, %v1200_v50 }
 0x8d7   :  { %v1217_v6 = vadd.f32 0.2548296, %v1215_v5  ;;  %v1234_v7 = vsub.f32 0.0, %v1230_v4 }
 0x8d9   :  { %v1219_v12 = vmul.f32 %v1217_v6, %v1200_v50  ;;  %v1236_v10 = vsel %vm1232_vm1, %v1230_v4, %v1234_v7 }
 0x8da   :  { %v1240_v18 = vadd.f32 1.0, %v1236_v10 }
 0x8db   :  { %v1229_v15 = vmul.f32 %v2366_v14, %v1219_v12  ;;  %v2332_v12 = vld [vmem:[%s2990_s6 + $0x1] ss:$0 sm:$0xff]  ;;  %s1907_s6 = sshll.u32 %s2461_s2, 4  ;;  %s1908_s6 = int_to_ptr.vmem [resolvable:$true] %s1907_s6 }
 0x8dc   :  { %v1242_v26 = vmul.f32 %v1240_v18, %v1238_v20 }
 0x8dd   :  { %v1231_v16 = vsub.f32 1.0, %v1229_v15 }
 0x8df   :  { %v1235_v17 = vsub.f32 0.0, %v1231_v16 }
 0x8e1   :  { %v1237_v19 = vsel %vm1233_vm5, %v1231_v16, %v1235_v17 }
 0x8e2   :  { %v1241_v25 = vadd.f32 1.0, %v1237_v19 }
 0x8e4   :  { %v1243_v28 = vmul.f32 %v1241_v25, %v1239_v23 }
 0x8e6   :  { %v1244_v29 = vpack.c.bf16 %v1243_v28, %v1242_v26 }
 0x8e8   :  { %2158 = vmatmul.msk.bf16.vlgmr.msra.gmra.mxu3 %vm1281_vm8, %v1244_v29 }
 0x96b   :  { %v1294_v31 = vpop.f32.mrf.mxu3 }
 0x96c   :  { %v1295_v32 = vadd.f32 %v2331_v3, %v1294_v31 }
 0x96e   :  { %v1299_v9 = vadd.f32 %v1295_v32, %v2756_v22 }
 0x970   :  { %1301 = vst.msk [vmem:[#allocation2] sm:$0xff] %vm3019_vm9, %v1299_v9 }
 0x973   :  { %v1296_v2 = vpop.f32.mrf.mxu3 }
 0x974   :  { %v1297_v13 = vadd.f32 %v2331_v3, %v1296_v2 }
 0x976   :  { %v1300_v8 = vadd.f32 %v1297_v13, %v2761_v27 }
 0x977   :  { %v2818_v33 = vld [vmem:[#allocation2] sm:$0xff] }
 0x978   :  { %1302 = vst.msk [vmem:[#allocation2 + $0x8] sm:$0x3] %vm3020_vm4, %v1300_v8  ;;  %v1305_v34 = vsel %vm3021_vm13, %v2818_v33, 0.0  ;;  %vm3025_vm13 = vmmov %vm3023_vm3 }
 0x979   :  { %1306 = vadd.xlane.f32.xlu0 %v1305_v34 }
 0x97f   :  { %v2823_v36 = vld [vmem:[#allocation2 + $0x8] sm:$0x3] }
 0x980   :  { %v1308_v37 = vsel %vm3022_vm2, %v2823_v36, 0.0  ;;  %vm3026_vm2 = vcmask 130048  }
 0x981   :  { %1309 = vadd.xlane.f32.xlu1 %v1308_v37 }
 0x9ec   :  { %v1307_v22 = vpop.xlane.xlu0 %1306 }
 0x9ed   :  { %v1311_v11 = vmul.f32 %v1307_v22, %v2649_v21 }
 0x9ef   :  { %v1313_v38 = vsub.f32 %v2818_v33, %v1311_v11 }
 0x9f1   :  { %v1315_v27 = vmul.f32 %v1313_v38, %v1313_v38 }
 0x9f3   :  { %v1317_v39 = vsel %vm3023_vm3, %v1315_v27, 0.0  ;;  %vm3027_vm3 = vcmask 123904  }
 0x9f4   :  { %v1310_v40 = vpop.xlane.xlu1 %1309  ;;  %1318 = vadd.xlane.f32.xlu2 %v1317_v39 }
 0x9f5   :  { %v1312_v41 = vmul.f32 %v1310_v40, %v2649_v21 }
 0x9f7   :  { %v1314_v42 = vsub.f32 %v2823_v36, %v1312_v41 }
 0x9f9   :  { %v1316_v43 = vmul.f32 %v1314_v42, %v1314_v42 }
 0x9fb   :  { %v1320_v44 = vsel %vm3024_vm11, %v1316_v43, 0.0  ;;  %vm3028_vm11 = vcmask 255104  }
 0x9fc   :  { %1321 = vadd.xlane.f32.xlu0 %v1320_v44 }
 0xa67   :  { %v1319_v47 = vpop.xlane.xlu2 %1318 }
 0xa68   :  { %v1323_v48 = vmul.f32 %v1319_v47, %v2649_v21 }
 0xa6a   :  { %v1325_v49 = vadd.f32 1e-06, %v1323_v48 }
 0xa6c   :  { %2367 = vrsqrt.f32 %v1325_v49  ;;  %vm1333_vm15 = vweird.f32 %v1325_v49 }
 0xa6f   :  { %v1322_v50 = vpop.xlane.xlu0 %1321 }
 0xa70   :  { %v1324_v51 = vmul.f32 %v1322_v50, %v2649_v21 }
 0xa72   :  { %v2368_v52 = vpop.eup %2367  ;;  %v1326_v53 = vadd.f32 1e-06, %v1324_v51 }
 0xa73   :  { %v1328_v54 = vmul.f32 %v2368_v52, %v1325_v49  ;;  %vm1334_vm12 = vweird.f32 %v2368_v52 }
 0xa74   :  { %2369 = vrsqrt.f32 %v1326_v53  ;;  %vm1335_vm5 = vmor %vm1333_vm15, %vm1334_vm12  ;;  %vm1343_vm9 = vweird.f32 %v1326_v53  ;;  %vm3030_vm15 = vcmask 261248  }
 0xa75   :  { %v1329_v55 = vmul.f32 %v2368_v52, %v1328_v54  ;;  %vm3029_vm12 = vmmov %vm3027_vm3 }
 0xa77   :  { %v1330_v56 = vmul.f32 0.5, %v1329_v55 }
 0xa79   :  { %v1331_v58 = vsub.f32 1.5, %v1330_v56 }
 0xa7a   :  { %v2370_v57 = vpop.eup %2369 }
 0xa7b   :  { %v1338_v59 = vmul.f32 %v2370_v57, %v1326_v53  ;;  %v1332_v61 = vmul.f32 %v2368_v52, %v1331_v58  ;;  %vm1344_vm1 = vweird.f32 %v2370_v57 }
 0xa7c   :  { %vm1345_vm4 = vmor %vm1343_vm9, %vm1344_vm1  ;;  %vm3031_vm1 = vcmask 392448  }
 0xa7d   :  { %v1339_v60 = vmul.f32 %v2370_v57, %v1338_v59  ;;  %v1336_v0 = vsel %vm1335_vm5, %v2368_v52, %v1332_v61  ;;  %vm3032_vm5 = vmmov %vm3026_vm2 }
 0xa7e   :  { %v1347_v5 = vmul.f32 %v1336_v0, %v1313_v38  ;;  %vm3033_vm9 = vmmov %vm3030_vm15 }
 0xa7f   :  { %v1340_v62 = vmul.f32 0.5, %v1339_v60 }
 0xa81   :  { %v1341_v63 = vsub.f32 1.5, %v1340_v62 }
 0xa83   :  { %v1342_v1 = vmul.f32 %v2370_v57, %v1341_v63 }
 0xa85   :  { %v1346_v4 = vsel %vm1345_vm4, %v2370_v57, %v1342_v1  ;;  %vm3034_vm4 = vmmov %vm3031_vm1 }
 0xa86   :  { %v1348_v6 = vmul.f32 %v1346_v4, %v1314_v42 }
 0xa88   :  { %v1349_v7 = vpack.c.bf16 %v1348_v6, %v1347_v5 }
 0xa8a   :  { %2172 = vmatmul.msk.bf16.vlgmr.msrb.gmra.mxu0 %vm3025_vm13, %v1349_v7  ;;  %vm3035_vm13 = vcmask 386304  }
 0xb07   :  { %v1384_v14 = vpop.f32.mrf.mxu0 }
 0xb08   :  { %v1385_v15 = vadd.f32 %v2332_v12, %v1384_v14 }
 0xb0a   :  { %1389 = vst.msk [vmem:[#allocation3] sm:$0xff] %vm3026_vm2, %v1385_v15  ;;  %1401 = vrot.lane.b32.xlu0 %v1385_v15, %s2454_s17  ;;  %1393 = vrot.lane.b32.xlu1 %v1385_v15, %s2457_s27  ;;  %vm3036_vm2 = vmmov %vm3028_vm11 }
 0xb0f   :  { %v1386_v10 = vpop.f32.mrf.mxu0 }
 0xb10   :  { %v1387_v16 = vadd.f32 %v2332_v12, %v1386_v10 }
 0xb12   :  { %1390 = vst.msk [vmem:[#allocation3 + $0x8] sm:$0x3] %vm3027_vm3, %v1387_v16  ;;  %1395 = vrot.lane.b32.xlu2 %v1387_v16, %s2457_s27  ;;  %1413 = vrot.lane.b32.xlu0 %v1385_v15, %s2458_s28  ;;  %vm3037_vm3 = vmmov %vm3035_vm13 }
 0xb13   :  { %1403 = vrot.lane.b32.xlu1 %v1387_v16, %s2454_s17 }
 0xb1a   :  { %1415 = vrot.lane.b32.xlu2 %v1387_v16, %s2458_s28  ;;  %s1909_s28 = sshll.u32 %s2999_s15, 4  ;;  %s1910_s28 = int_to_ptr.hbm [resolvable:$true] %s1909_s28 }
 0xb6c   :  { %v1396_v17 = vpop.permute.xlu2 %1395 }
 0xb6d   :  { %1400 = vst.msk [vmem:[#allocation3 + $0x8] sm:$0x3] %vm3028_vm11, %v1396_v17  ;;  %vm3038_vm11 = vmmov %vm3032_vm5 }
 0xb6e   :  { %1410 = vst.msk [vmem:[#allocation3 + $0x12] sm:$0x3] %vm3029_vm12, %v1396_v17  ;;  %vm3039_vm12 = vmmov %vm3032_vm5  ;;  %v2301_v17 = vld [vmem:[%s2991_s7 + $0x18] sm:$0xff] }
 0xb6f   :  { %1581 = vmatpush.bf16.msrb.mxu3 %v2301_v17 }
 0xb74   :  { %v1416_v25 = vpop.permute.xlu2 %1415 }
 0xb7c   :  { %v1402_v18 = vpop.permute.xlu0 %1401  ;;  %v1394_v19 = vpop.permute.xlu1 %1393 }
 0xb7d   :  { %1399 = vst.msk [vmem:[#allocation3] sm:$0xff] %vm3030_vm15, %v1394_v19  ;;  %vm3040_vm15 = vmmov %vm3032_vm5 }
 0xb7e   :  { %1407 = vst.msk [vmem:[#allocation3] sm:$0xff] %vm3031_vm1, %v1402_v18  ;;  %vm3041_vm1 = vmmov %vm3032_vm5 }
 0xb7f   :  { %1409 = vst.msk [vmem:[#allocation3 + $0xa] sm:$0xff] %vm3032_vm5, %v1394_v19 }
 0xb80   :  { %1411 = vst.msk [vmem:[#allocation3 + $0xa] sm:$0xff] %vm3033_vm9, %v1402_v18  ;;  %v2300_v18 = vld [vmem:[%s2991_s7 + $0x10] sm:$0xff] }
 0xb81   :  { %1582 = vmatpush.bf16.msrb.mxu3 %v2300_v18 }
 0xb84   :  { %v1414_v20 = vpop.permute.xlu0 %1413 }
 0xb85   :  { %1419 = vst.msk [vmem:[#allocation3 + $0xa] sm:$0xff] %vm3034_vm4, %v1414_v20  ;;  %v1404_v23 = vpop.permute.xlu1 %1403  ;;  %v1421_v26 = vld [vmem:[#allocation3] sm:$0xff] }
 0xb86   :  { %1408 = vst.msk [vmem:[#allocation3 + $0x8] sm:$0x3] %vm3035_vm13, %v1404_v23 }
 0xb87   :  { %1412 = vst.msk [vmem:[#allocation3 + $0x12] sm:$0x3] %vm3036_vm2, %v1404_v23 }
 0xb88   :  { %1420 = vst.msk [vmem:[#allocation3 + $0x12] sm:$0x3] %vm3037_vm3, %v1416_v25 }
 0xb8d   :  { %v1422_v28 = vld [vmem:[#allocation3 + $0x8] sm:$0xff] }
 0xb8e   :  { %v1424_v29 = vpack.c.bf16 %v1422_v28, %v1421_v26  ;;  %v2333_v28 = vld [vmem:[%s2992_s8 + $0x1] ss:$0 sm:$0xff] }
 0xb8f   :  { %v1423_v3 = vld [vmem:[#allocation3 + $0x10] sm:$0xf] }
 0xb90   :  { %1428 = vrot.lane.b32.xlu0 %v1424_v29, %s2457_s27  ;;  %v1425_v31 = vpack.c.bf16 %v1423_v3, %v1423_v3 }
 0xb92   :  { %1430 = vrot.lane.b32.xlu1 %v1425_v31, %s2457_s27 }
 0xc02   :  { %v1429_v2 = vpop.permute.xlu0 %1428 }
 0xc03   :  { %v1439_v13 = vsel %vm3039_vm12, %v1429_v2, 0 }
 0xc04   :  { %v1431_v32 = vpop.permute.xlu1 %1430 }
 0xc05   :  { %v1442_v9 = vsel %vm3038_vm11, %v1431_v32, 0 }
 0xc06   :  { %1450 = vmatpush.bf16.xpose.msrb.mxu1 %v1442_v9 }
 0xc0e   :  { %1451 = vmatpush.bf16.xpose.msrb.mxu1 %v1439_v13 }
 0xc15   :  { %2173 = vmatmul.msk.bf16.vlgmr.msrb.gmra.mxu1 %vm3040_vm15, %v1424_v29 }
 0xc25   :  { %2174 = vmatmul.msk.bf16.gmra.mxu1 %vm3041_vm1, %v1425_v31 }
 0xc92   :  { %v1453_v8 = vpop.f32.mrf.mxu1 }
 0xc93   :  { %v1462_v34 = vmul.f32 0.25, %v1453_v8 }
 0xc95   :  { %v1465_v37 = vadd.f32 %v1462_v34, %v2712_v24 }
 0xc97   :  { %v1468_v22 = vsel %vm956_vm14, %v1465_v37, -inf }
 0xc98   :  { %1469 = vmax.xlane.f32.xlu2 %v1468_v22 }
 0xc9a   :  { %v1455_v11 = vpop.f32.mrf.mxu1 }
 0xc9b   :  { %v1463_v38 = vmul.f32 0.25, %v1455_v11 }
 0xc9d   :  { %v1466_v27 = vadd.f32 %v1463_v38, %v2719_v30 }
 0xc9f   :  { %v1471_v39 = vsel %vm956_vm14, %v1466_v27, -inf }
 0xca0   :  { %1472 = vmax.xlane.f32.xlu1 %v1471_v39 }
 0xca2   :  { %v1458_v40 = vpop.f32.mrf.mxu1 }
 0xca3   :  { %v1464_v41 = vmul.f32 0.25, %v1458_v40 }
 0xca5   :  { %v1467_v42 = vadd.f32 %v1464_v41, %v2725_v35  ;;  %v2303_v41 = vld [vmem:[%s2993_s9 + $0x18] sm:$0xff] }
 0xca6   :  { %1667 = vmatpush.bf16.msra.mxu0 %v2303_v41 }
 0xca7   :  { %v1474_v43 = vsel %vm963_vm0, %v1467_v42, -inf }
 0xca8   :  { %1475 = vmax.xlane.f32.xlu0 %v1474_v43 }
 0xcaa   :  { %v1460_v44 = vpop.f32.mrf.mxu1 }
 0xcbc   :  { %1505 = vrot.lane.b32.xlu0 %v1425_v31, %s2454_s17 }
 0xd0b   :  { %v1470_v24 = vpop.xlane.xlu2 %1469 }
 0xd0c   :  { %v1477_v45 = vsub.f32 %v1465_v37, %v1470_v24 }
 0xd0e   :  { %v1480_v46 = vmul.f32 1.442695, %v1477_v45 }
 0xd10   :  { %2371 = vpow2.f32 %v1480_v46 }
 0xd13   :  { %v1473_v47 = vpop.xlane.xlu1 %1472 }
 0xd14   :  { %v1478_v48 = vsub.f32 %v1466_v27, %v1473_v47 }
 0xd16   :  { %v2372_v30 = vpop.eup %2371  ;;  %v1482_v49 = vmul.f32 1.442695, %v1478_v48 }
 0xd17   :  { %v1486_v50 = vsel %vm956_vm14, %v2372_v30, 0.0 }
 0xd18   :  { %2373 = vpow2.f32 %v1482_v49  ;;  %1487 = vadd.xlane.f32.xlu2 %v1486_v50 }
 0xd1b   :  { %v1476_v51 = vpop.xlane.xlu0 %1475 }
 0xd1c   :  { %v1479_v35 = vsub.f32 %v1467_v42, %v1476_v51  ;;  %v2302_v42 = vld [vmem:[%s2993_s9 + $0x10] sm:$0xff] }
 0xd1d   :  { %1668 = vmatpush.bf16.msra.mxu0 %v2302_v42  ;;  %v2304_v42 = vld [vmem:[%s2995_s11 + $0x20] sm:$0xff] }
 0xd1e   :  { %v2374_v52 = vpop.eup %2373  ;;  %v1484_v53 = vmul.f32 1.442695, %v1479_v35 }
 0xd1f   :  { %v1489_v54 = vsel %vm956_vm14, %v2374_v52, 0.0 }
 0xd20   :  { %2375 = vpow2.f32 %v1484_v53  ;;  %1490 = vadd.xlane.f32.xlu1 %v1489_v54 }
 0xd26   :  { %v2376_v55 = vpop.eup %2375 }
 0xd27   :  { %v1492_v56 = vsel %vm963_vm0, %v2376_v55, 0.0  ;;  %vm3042_vm0 = vmmov %vm3041_vm1 }
 0xd28   :  { %1493 = vadd.xlane.f32.xlu1 %v1492_v56 }
 0xd2e   :  { %v1506_v57 = vpop.permute.xlu0 %1505 }
 0xd2f   :  { %v1515_v58 = vsel %vm1004_vm10, %v1506_v57, 0  ;;  %vm3043_vm10 = vcmask 123904  }
 0xd30   :  { %1503 = vrot.lane.b32.xlu2 %v1424_v29, %s2454_s17  ;;  %1523 = vmatpush.bf16.msrb.mxu2 %v1515_v58 }
 0xd8b   :  { %v1488_v59 = vpop.xlane.xlu2 %1487 }
 0xd8c   :  { %2377 = vrcp.f32 %v1488_v59 }
 0xd92   :  { %v2378_v62 = vpop.eup %2377 }
 0xd93   :  { %v1504_v60 = vpop.permute.xlu2 %1503  ;;  %v1491_v61 = vpop.xlane.xlu1 %1490  ;;  %v1498_v0 = vmul.f32 %v2378_v62, %v2372_v30 }
 0xd94   :  { %2379 = vrcp.f32 %v1491_v61  ;;  %1524 = vmatpush.bf16.msrb.mxu2 %v1504_v60 }
 0xd9a   :  { %v2380_v63 = vpop.eup %2379 }
 0xd9b   :  { %v1499_v1 = vmul.f32 %v2380_v63, %v2374_v52  ;;  %v1494_v5 = vpop.xlane.xlu1 %1493  ;;  %v2334_v63 = vld [vmem:[%s2994_s10 + $0x1] ss:$0 sm:$0xff] }
 0xd9c   :  { %2381 = vrcp.f32 %v1494_v5 }
 0xd9d   :  { %v1501_v4 = vpack.c.bf16 %v1499_v1, %v1498_v0 }
 0xd9f   :  { %2175 = vmatmul.msk.bf16.vlgmr.msrb.gmra.mxu2 %vm956_vm14, %v1501_v4 }
 0xda2   :  { %v2382_v6 = vpop.eup %2381 }
 0xda3   :  { %v1500_v7 = vmul.f32 %v2382_v6, %v2376_v55 }
 0xda5   :  { %v1502_v12 = vpack.c.bf16 %v1500_v7, %v1500_v7 }
 0xdaf   :  { %2176 = vmatmul.msk.bf16.gmra.mxu2 %vm956_vm14, %v1502_v12  ;;  %vm3044_vm14 = vcmask 261120  }
 0xdb0   :  { %vm3045_vm5 = vmmov %vm3044_vm14 }
 0xdb1   :  { %vm3049_vm15 = vmmov %vm3045_vm5 }
 0xe22   :  { %v1526_v14 = vpop.f32.mrf.mxu2 }
 0xe23   :  { %1535 = vst.msk [vmem:[#allocation4] sm:$0xff] %vm3042_vm0, %v1526_v14 }
 0xe2a   :  { %v1528_v15 = vpop.f32.mrf.mxu2 }
 0xe2b   :  { %1536 = vst.msk [vmem:[#allocation4 + $0x8] sm:$0x3] %vm3043_vm10, %v1528_v15  ;;  %1539 = vrot.lane.b32.xlu1 %v1528_v15, %s2460_s29 }
 0xe32   :  { %v1531_v10 = vpop.f32.mrf.mxu2 }
 0xe33   :  { %1541 = vrot.lane.b32.xlu0 %v1531_v10, %s2460_s29 }
 0xe3a   :  { %v1533_v16 = vpop.f32.mrf.mxu2 }
 0xe9d   :  { %v1540_v19 = vpop.permute.xlu1 %1539 }
 0xe9e   :  { %1545 = vst.msk [vmem:[#allocation4 - $0x2] sm:$0xfc] %vm1036_vm6, %v1540_v19  ;;  %vm3046_vm6 = vcmask 254976  }
 0xe9f   :  { %vm3048_vm9 = vmmov %vm3046_vm6 }
 0xea5   :  { %v1542_v20 = vpop.permute.xlu0 %1541 }
 0xea6   :  { %1546 = vst.msk [vmem:[#allocation4 + $0x6] sm:$0xf] %vm1038_vm7, %v1542_v20  ;;  %vm3047_vm7 = vmmov %vm3045_vm5 }
 0xead   :  { %v1547_v23 = vld [vmem:[#allocation4] sm:$0xff]  ;;  %v1548_v25 = vld [vmem:[#allocation4 + $0x8] sm:$0x3] }
 0xeae   :  { %v1549_v26 = vpack.c.bf16 %v1548_v25, %v1547_v23  ;;  %v2307_v23 = vld [vmem:[%s2995_s11 + $0x38] sm:$0xff] }
 0xeaf   :  { %1801 = vmatpush.bf16.msra.mxu3 %v2307_v23 }
 0xeb0   :  { %2190 = vmatmul.msk.bf16.vlgmr.msrb.gmra.mxu3 %vm3044_vm14, %v1549_v26 }
 0xf33   :  { %v1584_v29 = vpop.f32.mrf.mxu3 }
 0xf34   :  { %v1585_v3 = vadd.f32 %v2333_v28, %v1584_v29 }
 0xf36   :  { %v2900_v31 = vadd.f32 %v1585_v3, %v2818_v33  ;;  %v2306_v3 = vld [vmem:[%s2995_s11 + $0x30] sm:$0xff] }
 0xf37   :  { %1802 = vmatpush.bf16.msra.mxu3 %v2306_v3 }
 0xf38   :  { %v1591_v32 = vsel %vm3045_vm5, %v2900_v31, 0.0 }
 0xf39   :  { %1592 = vadd.xlane.f32.xlu2 %v1591_v32 }
 0xf3b   :  { %v1586_v9 = vpop.f32.mrf.mxu3 }
 0xf3c   :  { %v1587_v2 = vadd.f32 %v2333_v28, %v1586_v9 }
 0xf3e   :  { %v2905_v13 = vadd.f32 %v1587_v2, %v2823_v36 }
 0xf40   :  { %v1594_v8 = vsel %vm3046_vm6, %v2905_v13, 0.0 }
 0xf41   :  { %1595 = vadd.xlane.f32.xlu0 %v1594_v8 }
 0xfac   :  { %v1593_v34 = vpop.xlane.xlu2 %1592 }
 0xfad   :  { %v1597_v37 = vmul.f32 %v1593_v34, %v2649_v21 }
 0xfaf   :  { %v1599_v22 = vsub.f32 %v2900_v31, %v1597_v37 }
 0xfb1   :  { %v1601_v33 = vmul.f32 %v1599_v22, %v1599_v22 }
 0xfb3   :  { %v1603_v11 = vsel %vm3047_vm7, %v1601_v33, 0.0  ;;  %v2305_v33 = vld [vmem:[%s2995_s11 + $0x28] sm:$0xff] }
 0xfb4   :  { %v1596_v38 = vpop.xlane.xlu0 %1595  ;;  %1604 = vadd.xlane.f32.xlu1 %v1603_v11  ;;  %1803 = vmatpush.bf16.msra.mxu3 %v2305_v33 }
 0xfb5   :  { %v1598_v27 = vmul.f32 %v1596_v38, %v2649_v21 }
 0xfb7   :  { %v1600_v39 = vsub.f32 %v2905_v13, %v1598_v27 }
 0xfb8   :  { %1804 = vmatpush.bf16.msra.mxu3 %v2304_v42  ;;  %v2308_v42 = vld [vmem:[%s2997_s13] sm:$0xff] }
 0xfb9   :  { %v1602_v36 = vmul.f32 %v1600_v39, %v1600_v39 }
 0xfbb   :  { %v1606_v40 = vsel %vm3048_vm9, %v1602_v36, 0.0 }
 0xfbc   :  { %1607 = vadd.xlane.f32.xlu2 %v1606_v40 }
0x1027   :  { %v1605_v43 = vpop.xlane.xlu1 %1604 }
0x1028   :  { %v1609_v44 = vmul.f32 %v1605_v43, %v2649_v21 }
0x102a   :  { %v1611_v24 = vadd.f32 1e-06, %v1609_v44 }
0x102c   :  { %2383 = vrsqrt.f32 %v1611_v24  ;;  %vm1619_vm13 = vweird.f32 %v1611_v24 }
0x102f   :  { %v1608_v45 = vpop.xlane.xlu2 %1607 }
0x1030   :  { %v1610_v46 = vmul.f32 %v1608_v45, %v2649_v21 }
0x1032   :  { %v2384_v47 = vpop.eup %2383  ;;  %v1612_v48 = vadd.f32 1e-06, %v1610_v46 }
0x1033   :  { %v1614_v30 = vmul.f32 %v2384_v47, %v1611_v24  ;;  %vm1620_vm4 = vweird.f32 %v2384_v47 }
0x1034   :  { %2385 = vrsqrt.f32 %v1612_v48  ;;  %vm1621_vm3 = vmor %vm1619_vm13, %vm1620_vm4  ;;  %vm1629_vm11 = vweird.f32 %v1612_v48 }
0x1035   :  { %v1615_v49 = vmul.f32 %v2384_v47, %v1614_v30 }
0x1037   :  { %v1616_v50 = vmul.f32 0.5, %v1615_v49 }
0x1039   :  { %v1617_v35 = vsub.f32 1.5, %v1616_v50 }
0x103a   :  { %v2386_v51 = vpop.eup %2385 }
0x103b   :  { %v1624_v52 = vmul.f32 %v2386_v51, %v1612_v48  ;;  %v1618_v54 = vmul.f32 %v2384_v47, %v1617_v35  ;;  %vm1630_vm2 = vweird.f32 %v2386_v51 }
0x103c   :  { %vm1631_vm12 = vmor %vm1629_vm11, %vm1630_vm2 }
0x103d   :  { %v1625_v53 = vmul.f32 %v2386_v51, %v1624_v52  ;;  %v1622_v57 = vsel %vm1621_vm3, %v2384_v47, %v1618_v54  ;;  %vm3050_vm2 = vmmov %vm3049_vm15  ;;  %vm3051_vm3 = vcmask 254976  }
0x103e   :  { %v1633_v60 = vmul.f32 %v1622_v57, %v1599_v22  ;;  %vm3052_vm11 = vmmov %vm3050_vm2 }
0x103f   :  { %v1626_v55 = vmul.f32 0.5, %v1625_v53 }
0x1041   :  { %v1627_v56 = vsub.f32 1.5, %v1626_v55 }
0x1043   :  { %v1628_v58 = vmul.f32 %v2386_v51, %v1627_v56 }
0x1045   :  { %v1632_v59 = vsel %vm1631_vm12, %v2386_v51, %v1628_v58  ;;  %vm3054_vm12 = vmmov %vm3050_vm2 }
0x1046   :  { %v1634_v61 = vmul.f32 %v1632_v59, %v1600_v39 }
0x1048   :  { %v1635_v62 = vpack.c.bf16 %v1634_v61, %v1633_v60 }
0x104a   :  { %2204 = vmatmul.msk.bf16.vlgmr.msra.gmra.mxu0 %vm3049_vm15, %v1635_v62  ;;  %vm3055_vm15 = vmmov %vm3051_vm3 }
0x10c7   :  { %v1670_v0 = vpop.f32.mrf.mxu0 }
0x10c8   :  { %v2927_v1 = vadd.f32 %v2334_v63, %v1670_v0 }
0x10ca   :  { %v2930_v4 = vmul.f32 0.70710677, %v2927_v1 }
0x10cc   :  { %v1677_v5 = vand.u32 2147483647, %v2930_v4  ;;  %vm1743_vm4 = vcmp.ge.f32.partialorder %v2930_v4, 0.0  ;;  %v2335_v4 = vld [vmem:[%s2996_s12 + $0x1] ss:$0 sm:$0xff] }
0x10ce   :  { %v1679_v6 = vmul.f32 0.3275911, %v1677_v5  ;;  %v1731_v34 = vsub.f32 0.0, %v1677_v5 }
0x10cf   :  { %v1672_v7 = vpop.f32.mrf.mxu0 }
0x10d0   :  { %v1681_v12 = vadd.f32 1.0, %v1679_v6  ;;  %v2933_v14 = vadd.f32 %v2334_v63, %v1672_v7  ;;  %v1733_v39 = vmul.f32 %v1731_v34, %v1677_v5 }
0x10d2   :  { %2387 = vrcp.f32 %v1681_v12  ;;  %v2936_v15 = vmul.f32 0.70710677, %v2933_v14  ;;  %v1694_v25 = vand.u32 2147483648, %v1681_v12  ;;  %v1692_v28 = vand.u32 2147483647, %v1681_v12 }
0x10d3   :  { %vm1688_vm0 = vweird.f32 %v1681_v12  ;;  %v1735_v45 = vmul.f32 1.442695, %v1733_v39  ;;  %v1750_v23 = vmul.f32 0.5, %v2933_v14 }
0x10d4   :  { %v1678_v10 = vand.u32 2147483647, %v2936_v15  ;;  %v1695_v32 = vor.u32 1.1754944e-38, %v1694_v25  ;;  %vm1693_vm14 = vcmp.eq.f32.partialorder %v1692_v28, 8.507059e+37  ;;  %vm1744_vm13 = vcmp.ge.f32.partialorder %v2936_v15, 0.0 }
0x10d6   :  { %v1680_v16 = vmul.f32 0.3275911, %v1678_v10  ;;  %v1732_v30 = vsub.f32 0.0, %v1678_v10 }
0x10d8   :  { %v2388_v17 = vpop.eup %2387  ;;  %v1682_v19 = vadd.f32 1.0, %v1680_v16  ;;  %v1734_v52 = vmul.f32 %v1732_v30, %v1678_v10 }
0x10d9   :  { %v1684_v18 = vmul.f32 %v2388_v17, %v1681_v12  ;;  %vm1689_vm1 = vweird.f32 %v2388_v17 }
0x10da   :  { %2389 = vrcp.f32 %v1682_v19  ;;  %vm1690_vm10 = vmor %vm1688_vm0, %vm1689_vm1  ;;  %v1709_v27 = vand.u32 2147483648, %v1682_v19  ;;  %v1707_v40 = vand.u32 2147483647, %v1682_v19  ;;  %vm1703_vm6 = vweird.f32 %v1682_v19 }
0x10db   :  { %v1685_v20 = vsub.f32 1.0, %v1684_v18  ;;  %2391 = vpow2.f32 %v1735_v45  ;;  %v1737_v57 = vmul.f32 1.442695, %v1734_v52 }
0x10dc   :  { %v1710_v24 = vor.u32 1.1754944e-38, %v1709_v27  ;;  %vm1708_vm9 = vcmp.eq.f32.partialorder %v1707_v40, 8.507059e+37 }
0x10dd   :  { %v1686_v26 = vmul.f32 %v2388_v17, %v1685_v20  ;;  %2393 = vpow2.f32 %v1737_v57  ;;  %v1749_v20 = vmul.f32 0.5, %v2927_v1 }
0x10df   :  { %v1687_v29 = vadd.f32 %v2388_v17, %v1686_v26 }
0x10e0   :  { %v2390_v9 = vpop.eup %2389 }
0x10e1   :  { %v1691_v2 = vsel %vm1690_vm10, %v2388_v17, %v1687_v29  ;;  %v1699_v37 = vmul.f32 %v2390_v9, %v1682_v19  ;;  %vm1704_vm5 = vweird.f32 %v2390_v9  ;;  %v2392_v58 = vpop.eup %2391 }
0x10e2   :  { %v1696_v8 = vsel %vm1693_vm14, %v1695_v32, %v1691_v2  ;;  %vm1705_vm7 = vmor %vm1703_vm6, %vm1704_vm5 }
0x10e3   :  { %v1713_v22 = vmul.f32 1.0614054, %v1696_v8  ;;  %v1700_v11 = vsub.f32 1.0, %v1699_v37  ;;  %v2394_v7 = vpop.eup %2393 }
0x10e5   :  { %v1715_v38 = vadd.f32 -1.4531521, %v1713_v22  ;;  %v1701_v36 = vmul.f32 %v2390_v9, %v1700_v11 }
0x10e7   :  { %v1717_v41 = vmul.f32 %v1715_v38, %v1696_v8  ;;  %v1702_v43 = vadd.f32 %v2390_v9, %v1701_v36 }
0x10e9   :  { %v1719_v44 = vadd.f32 1.4214138, %v1717_v41  ;;  %v1706_v46 = vsel %vm1705_vm7, %v2390_v9, %v1702_v43  ;;  %v2309_v41 = vld [vmem:[%s2997_s13 + $0x8] sm:$0xff]  ;;  %vm3056_vm7 = vmmov %vm3050_vm2 }
0x10ea   :  { %v1711_v48 = vsel %vm1708_vm9, %v1710_v24, %v1706_v46  ;;  %1891 = vmatpush.bf16.msrb.mxu0 %v2309_v41  ;;  %vm1898_vm9 = vcmask 73728  }
0x10eb   :  { %v1721_v47 = vmul.f32 %v1719_v44, %v1696_v8  ;;  %v1714_v49 = vmul.f32 1.0614054, %v1711_v48 }
0x10ed   :  { %v1723_v50 = vadd.f32 -0.28449672, %v1721_v47  ;;  %v1716_v51 = vadd.f32 -1.4531521, %v1714_v49 }
0x10ee   :  { %1892 = vmatpush.bf16.msrb.mxu0 %v2308_v42 }
0x10ef   :  { %v1725_v35 = vmul.f32 %v1723_v50, %v1696_v8  ;;  %v1718_v53 = vmul.f32 %v1716_v51, %v1711_v48 }
0x10f1   :  { %v1727_v54 = vadd.f32 0.2548296, %v1725_v35  ;;  %v1720_v55 = vadd.f32 1.4214138, %v1718_v53 }
0x10f3   :  { %v1729_v56 = vmul.f32 %v1727_v54, %v1696_v8  ;;  %v1722_v59 = vmul.f32 %v1720_v55, %v1711_v48 }
0x10f5   :  { %v1739_v60 = vmul.f32 %v2392_v58, %v1729_v56  ;;  %v1724_v61 = vadd.f32 -0.28449672, %v1722_v59 }
0x10f7   :  { %v1741_v62 = vsub.f32 1.0, %v1739_v60  ;;  %v1726_v63 = vmul.f32 %v1724_v61, %v1711_v48 }
0x10f9   :  { %v1728_v0 = vadd.f32 0.2548296, %v1726_v63  ;;  %v1745_v5 = vsub.f32 0.0, %v1741_v62 }
0x10fb   :  { %v1730_v6 = vmul.f32 %v1728_v0, %v1711_v48  ;;  %v1747_v10 = vsel %vm1743_vm4, %v1741_v62, %v1745_v5  ;;  %v2336_v62 = vld [vmem:[%s2998_s14] ss:$0 sm:$0xff]  ;;  %vm1900_vm4 = vcmask 78853  }
0x10fc   :  { %v1751_v18 = vadd.f32 1.0, %v1747_v10 }
0x10fd   :  { %v1740_v12 = vmul.f32 %v2394_v7, %v1730_v6 }
0x10fe   :  { %v1753_v26 = vmul.f32 %v1751_v18, %v1749_v20 }
0x10ff   :  { %v1742_v16 = vsub.f32 1.0, %v1740_v12 }
0x1101   :  { %v1746_v17 = vsub.f32 0.0, %v1742_v16 }
0x1103   :  { %v1748_v19 = vsel %vm1744_vm13, %v1742_v16, %v1746_v17 }
0x1104   :  { %v1752_v25 = vadd.f32 1.0, %v1748_v19 }
0x1106   :  { %v1754_v28 = vmul.f32 %v1752_v25, %v1750_v23 }
0x1108   :  { %v1755_v29 = vpack.c.bf16 %v1754_v28, %v1753_v26 }
0x110a   :  { %2230 = vmatmul.msk.bf16.vlgmr.msra.gmra.mxu3 %vm1281_vm8, %v1755_v29  ;;  %vm3053_vm8 = vmmov %vm3051_vm3 }
0x118d   :  { %v1806_v3 = vpop.f32.mrf.mxu3 }
0x118e   :  { %v1807_v32 = vadd.f32 %v2335_v4, %v1806_v3 }
0x1190   :  { %v1811_v9 = vadd.f32 %v1807_v32, %v2900_v31 }
0x1192   :  { %1813 = vst.msk [vmem:[#allocation2] sm:$0xff] %vm3050_vm2, %v1811_v9 }
0x1195   :  { %v1808_v15 = vpop.f32.mrf.mxu3 }
0x1196   :  { %v1809_v1 = vadd.f32 %v2335_v4, %v1808_v15 }
0x1198   :  { %v1812_v14 = vadd.f32 %v1809_v1, %v2905_v13 }
0x1199   :  { %v1815_v2 = vld [vmem:[#allocation2] sm:$0xff] }
0x119a   :  { %1814 = vst.msk [vmem:[#allocation2 + $0x8] sm:$0x3] %vm3051_vm3, %v1812_v14  ;;  %v1817_v8 = vsel %vm3052_vm11, %v1815_v2, 0.0 }
0x119b   :  { %1818 = vadd.xlane.f32.xlu0 %v1817_v8 }
0x11a1   :  { %v1816_v34 = vld [vmem:[#allocation2 + $0x8] sm:$0x3] }
0x11a2   :  { %v1820_v37 = vsel %vm3053_vm8, %v1816_v34, 0.0 }
0x11a3   :  { %1821 = vadd.xlane.f32.xlu2 %v1820_v37 }
0x120e   :  { %v1819_v22 = vpop.xlane.xlu0 %1818 }
0x120f   :  { %v1823_v33 = vmul.f32 %v1819_v22, %v2649_v21 }
0x1211   :  { %v1825_v31 = vsub.f32 %v1815_v2, %v1823_v33 }
0x1213   :  { %v1827_v11 = vmul.f32 %v1825_v31, %v1825_v31 }
0x1215   :  { %v1829_v38 = vsel %vm3054_vm12, %v1827_v11, 0.0 }
0x1216   :  { %v1822_v27 = vpop.xlane.xlu2 %1821  ;;  %1830 = vadd.xlane.f32.xlu0 %v1829_v38 }
0x1217   :  { %v1824_v13 = vmul.f32 %v1822_v27, %v2649_v21 }
0x1219   :  { %v1826_v39 = vsub.f32 %v1816_v34, %v1824_v13 }
0x121b   :  { %v1828_v36 = vmul.f32 %v1826_v39, %v1826_v39 }
0x121d   :  { %v1832_v40 = vsel %vm3055_vm15, %v1828_v36, 0.0 }
0x121e   :  { %1833 = vadd.xlane.f32.xlu2 %v1832_v40 }
0x1289   :  { %v1831_v43 = vpop.xlane.xlu0 %1830 }
0x128a   :  { %v1835_v44 = vmul.f32 %v1831_v43, %v2649_v21 }
0x128c   :  { %v1837_v24 = vadd.f32 1e-06, %v1835_v44 }
0x128e   :  { %2395 = vrsqrt.f32 %v1837_v24  ;;  %vm1845_vm0 = vweird.f32 %v1837_v24 }
0x1291   :  { %v1834_v45 = vpop.xlane.xlu2 %1833 }
0x1292   :  { %v1836_v46 = vmul.f32 %v1834_v45, %v2649_v21 }
0x1294   :  { %v2396_v47 = vpop.eup %2395  ;;  %v1838_v48 = vadd.f32 1e-06, %v1836_v46 }
0x1295   :  { %v1840_v30 = vmul.f32 %v2396_v47, %v1837_v24  ;;  %vm1846_vm1 = vweird.f32 %v2396_v47 }
0x1296   :  { %2397 = vrsqrt.f32 %v1838_v48  ;;  %vm1847_vm14 = vmor %vm1845_vm0, %vm1846_vm1  ;;  %vm1855_vm5 = vweird.f32 %v1838_v48 }
0x1297   :  { %v1841_v49 = vmul.f32 %v2396_v47, %v1840_v30 }
0x1299   :  { %v1842_v50 = vmul.f32 0.5, %v1841_v49 }
0x129b   :  { %v1843_v35 = vsub.f32 1.5, %v1842_v50 }
0x129c   :  { %v2398_v51 = vpop.eup %2397 }
0x129d   :  { %v1850_v52 = vmul.f32 %v2398_v51, %v1838_v48  ;;  %v1844_v54 = vmul.f32 %v2396_v47, %v1843_v35  ;;  %vm1856_vm10 = vweird.f32 %v2398_v51 }
0x129e   :  { %vm1857_vm6 = vmor %vm1855_vm5, %vm1856_vm10 }
0x129f   :  { %v1851_v53 = vmul.f32 %v2398_v51, %v1850_v52  ;;  %v1848_v57 = vsel %vm1847_vm14, %v2396_v47, %v1844_v54 }
0x12a0   :  { %v1859_v59 = vmul.f32 %v1848_v57, %v1825_v31 }
0x12a1   :  { %v1852_v55 = vmul.f32 0.5, %v1851_v53 }
0x12a3   :  { %v1853_v56 = vsub.f32 1.5, %v1852_v55 }
0x12a5   :  { %v1854_v58 = vmul.f32 %v2398_v51, %v1853_v56 }
0x12a7   :  { %v1858_v21 = vsel %vm1857_vm6, %v2398_v51, %v1854_v58 }
0x12a8   :  { %v1860_v60 = vmul.f32 %v1858_v21, %v1826_v39 }
0x12aa   :  { %v1861_v61 = vpack.c.bf16 %v1860_v60, %v1859_v59 }
0x12ac   :  { %2239 = vmatmul.msk.bf16.vlgmr.msrb.gmra.mxu0 %vm3056_vm7, %v1861_v61 }
0x1329   :  { %v1894_v63 = vpop.f32.mrf.mxu0 }
0x132a   :  { %v1895_v0 = vadd.f32 %v2336_v62, %v1894_v63 }
0x132c   :  { %1899 = vst.msk [vmem:[#allocation8] sm:$0x1] %vm1898_vm9, %v1895_v0 }
0x132d   :  { %1901 = vst.msk [vmem:[#allocation8 - $0x4] sm:$0x20] %vm1900_vm4, %v1895_v0 }
0x132e   :  { %1912 = dma.vmem_to_hbm [thread:$0]  %s1908_s6, 32, %s1910_s28, [#allocation7]  }
0x1331   :  { %v1896_v5 = vpop.f32.mrf.mxu0 }
0x1332   :  { %2449 = dma.done.wait [#allocation7], 32  }
0x1333   :  { %2450 = vsyncadd [#allocation7], 4294967264 }
0x1334   :  { %1917 = vsyncpa [#allocation6], 1 }
0x1335   :  { %1918 = vsyncpa [#allocation7], 1 }

</bundles_post_ra>
